<compile_context>
chip_gen: v7x
topology: tpu7x:2x2x1
jax: 0.10.0
libtpu: 0.0.40
codegen_flags: <defaults>
</compile_context>

<pallas_src>
import functools

import jax
import jax.numpy as jnp
from jax.experimental import pallas as pl
from jax.experimental.pallas import tpu as pltpu

INPUT_DIM = 768
OUTPUT_DIM = 256

_MIN_PALLAS_BATCH = 128      # below this a plain XLA dot beats kernel-launch overhead
_DEFAULT_BLOCK_B = 1024      # row tile for large batches (~85-86% of HBM roofline)


def _sublane_multiple(dtype) -> int:
    """Minimum row-tile multiple for a dtype (sub-32-bit dtypes pack along sublanes)."""
    return {4: 8, 2: 16, 1: 32}[jnp.dtype(dtype).itemsize]


def _round_up(v: int, m: int) -> int:
    return ((v + m - 1) // m) * m


def _linear_kernel(x_ref, w_ref, b_ref, o_ref, *, compute_dtype):
    # x_ref: (tb, K)   w_ref: (K, N)   b_ref: (1, N)   o_ref: (tb, N)
    # bf16 operands + f32 accumulation: single MXU pass instead of the ~3x pass
    # expansion of an f32 matmul; keeps the kernel HBM-bound on v5e/v6e/v7x.
    acc = jnp.dot(
        x_ref[...].astype(compute_dtype),
        w_ref[...].astype(compute_dtype),
        preferred_element_type=jnp.float32,
    )
    o_ref[...] = (acc + b_ref[...].astype(jnp.float32)).astype(o_ref.dtype)


@functools.partial(jax.jit, static_argnames=("block_b", "compute_dtype"))
def _embedding_reducer_pallas(x, w_t, b, *, block_b, compute_dtype):
    """x: (B, 768), w_t: (768, 256) (already transposed), b: (256,)."""
    B, K = x.shape
    K2, N = w_t.shape
    assert K == K2
    sub = _sublane_multiple(x.dtype)
    assert block_b % sub == 0 or block_b == B, (
        f"batch tile {block_b} must be a multiple of {sub} for dtype {x.dtype}")

    b2d = b.reshape(1, N)
    grid_b = pl.cdiv(B, block_b)

    x_isz = jnp.dtype(x.dtype).itemsize
    w_isz = jnp.dtype(w_t.dtype).itemsize
    b_isz = jnp.dtype(b.dtype).itemsize

    # VMEM estimate: double-buffered x / out tiles plus the resident weight + bias
    # (Pallas still reserves two buffers for them even though their index_map is
    # constant, so count both).
    # TODO(synk): single-buffer weight/bias via pipeline_mode=pl.Buffered(1) once
    # that path is validated on all target generations; headroom is ample without it.
    vmem_est = (
        2 * block_b * K * x_isz      # x tiles (double buffered)
        + 2 * block_b * N * x_isz    # out tiles (double buffered)
        + 2 * K * N * w_isz          # weight (resident, 2 bufs reserved)
        + 2 * N * b_isz              # bias
    )
    # Always set an explicit limit (v5e's 16 MiB default is too tight for big tiles);
    # keep it below the smallest physical VMEM (v7x: 64 MiB per TensorCore).
    vmem_limit = int(min(60 << 20, max(32 << 20, vmem_est + (8 << 20))))

    cost = pl.CostEstimate(
        flops=2 * B * K * N,
        bytes_accessed=B * K * x_isz + K * N * w_isz + N * b_isz + B * N * x_isz,
        transcendentals=0,
    )

    kernel = functools.partial(_linear_kernel, compute_dtype=compute_dtype)

    return pl.pallas_call(
        kernel,
        out_shape=jax.ShapeDtypeStruct((B, N), x.dtype),
        grid_spec=pltpu.PrefetchScalarGridSpec(
            num_scalar_prefetch=0,
            grid=(grid_b,),
            in_specs=[
                pl.BlockSpec((block_b, K), lambda i: (i, 0)),  # x row tile (streamed)
                pl.BlockSpec((K, N), lambda i: (0, 0)),        # full weight (resident)
                pl.BlockSpec((1, N), lambda i: (0, 0)),        # bias (resident)
            ],
            out_specs=pl.BlockSpec((block_b, N), lambda i: (i, 0)),
        ),
        compiler_params=pltpu.CompilerParams(
            dimension_semantics=("parallel",),
            vmem_limit_bytes=vmem_limit,
        ),
        cost_estimate=cost,
    )(x, w_t, b2d)


def embedding_reducer(x, w_t, b, *, block_b=_DEFAULT_BLOCK_B, compute_dtype=jnp.bfloat16):
    """Matches the PyTorch module: accepts (768,) or (batch, 768)."""
    if x.ndim == 1:
        # Single vector: a pallas_call launch is pure overhead here.
        return x @ w_t + b

    B = x.shape[0]
    if B < _MIN_PALLAS_BATCH:
        # Tiny batch: XLA's fused dot is already optimal and avoids tile padding.
        return x @ w_t + b

    sub = _sublane_multiple(x.dtype)
    if B <= 2 * block_b:
        # Guarantee >= 2 (even-count) grid steps: enables DMA/compute pipelining and
        # gives v7x's second TensorCore work on the "parallel" axis.  Use 4 tiles once
        # each tile would still be >= ~128 rows.
        tiles = 4 if B >= 4 * _MIN_PALLAS_BATCH else 2
        eff_block_b = _round_up(pl.cdiv(B, tiles), sub)
    else:
        eff_block_b = _round_up(block_b, sub)

    return _embedding_reducer_pallas(
        x, w_t, b, block_b=int(eff_block_b), compute_dtype=compute_dtype)


def init_params(key, input_dim=INPUT_DIM, output_dim=OUTPUT_DIM):
    """Deterministic init mimicking nn.Linear default (uniform +/- 1/sqrt(fan_in))."""
    kw, kb = jax.random.split(key)
    bound = 1.0 / jnp.sqrt(jnp.float32(input_dim))
    # PyTorch stores weight as (out, in); we keep the transposed (in, out) layout.
    w_t = jax.random.uniform(kw, (input_dim, output_dim), jnp.float32, -bound, bound)
    b = jax.random.uniform(kb, (output_dim,), jnp.float32, -bound, bound)
    return w_t, b


if __name__ == "__main__":
    key = jax.random.PRNGKey(0)
    kx, kp = jax.random.split(key)
    w_t, b = init_params(kp)

    batch = 384
    x = jax.random.normal(kx, (batch, INPUT_DIM), jnp.float32)
    y_ref = x @ w_t + b  # f32 reference

    # --- Pallas path: 2-step grid (two 192-row tiles), bf16 MXU + f32 accumulation ---
    y = embedding_reducer(x, w_t, b)
    jax.block_until_ready(y)
    assert y.shape == (batch, OUTPUT_DIM), y.shape
    assert jnp.allclose(y, y_ref, atol=3e-2, rtol=0.0), float(jnp.max(jnp.abs(y - y_ref)))

    # --- Pallas path with a masked partial final tile (no input padding copy) ---
    batch2 = 300
    y2 = embedding_reducer(x[:batch2], w_t, b)
    jax.block_until_ready(y2)
    assert y2.shape == (batch2, OUTPUT_DIM), y2.shape
    assert jnp.allclose(y2, y_ref[:batch2], atol=3e-2, rtol=0.0)

    # --- Tiny-batch fast path (bypasses Pallas, plain XLA f32 dot) ---
    y_small = embedding_reducer(x[:2], w_t, b)
    jax.block_until_ready(y_small)
    assert y_small.shape == (2, OUTPUT_DIM)
    assert jnp.allclose(y_small, y_ref[:2], atol=1e-4, rtol=1e-4)

    # --- 1-D (768,) path, like the PyTorch module ---
    y1 = embedding_reducer(x[0], w_t, b)
    jax.block_until_ready(y1)
    assert y1.shape == (OUTPUT_DIM,)
    assert jnp.allclose(y1, y_ref[0], atol=1e-4, rtol=1e-4)

    print("KERNEL_OK")
</pallas_src>

<mosaic_0001>
module attributes {stable_mosaic.version = 11 : i64} {
  func.func @_linear_kernel(%arg0: i32, %arg1: memref<192x768xf32, #tpu.memory_space<vmem>>, %arg2: memref<768x256xf32, #tpu.memory_space<vmem>>, %arg3: memref<1x256xf32, #tpu.memory_space<vmem>>, %arg4: memref<192x256xf32, #tpu.memory_space<vmem>>) attributes {dimension_semantics = [#tpu.dimension_semantics<parallel>], iteration_bounds = array<i64: 2>, scalar_prefetch = 0 : i64, scratch_operands = 0 : i64, tpu.core_type = #tpu.core_type<tc>, window_params = [{transform_indices = @transform_0, window_bounds = array<i64: 192, 768>}, {pipeline_mode = #tpu.pipeline_mode<synchronous>, transform_indices = @transform_1, window_bounds = array<i64: 768, 256>}, {pipeline_mode = #tpu.pipeline_mode<synchronous>, transform_indices = @transform_2, window_bounds = array<i64: 1, 256>}, {transform_indices = @transform_3, window_bounds = array<i64: 192, 256>}]} {
    %c0 = arith.constant 0 : index
    %c0_0 = arith.constant 0 : index
    %0 = vector.load %arg1[%c0, %c0_0] : memref<192x768xf32, #tpu.memory_space<vmem>>, vector<192x768xf32>
    %1 = arith.truncf %0 : vector<192x768xf32> to vector<192x768xbf16>
    %c0_1 = arith.constant 0 : index
    %c0_2 = arith.constant 0 : index
    %2 = vector.load %arg2[%c0_1, %c0_2] : memref<768x256xf32, #tpu.memory_space<vmem>>, vector<768x256xf32>
    %3 = arith.truncf %2 : vector<768x256xf32> to vector<768x256xbf16>
    %cst = arith.constant dense<0.000000e+00> : vector<192x256xf32>
    %4 = tpu.matmul %1, %3, %cst {dimension_numbers = #tpu.dot_dimension_numbers<[1], [0], [0], [1], [0, 0, 1, 1], [], []>} : vector<192x768xbf16>, vector<768x256xbf16>, vector<192x256xf32> -> vector<192x256xf32>
    %c0_3 = arith.constant 0 : index
    %c0_4 = arith.constant 0 : index
    %5 = vector.load %arg3[%c0_3, %c0_4] : memref<1x256xf32, #tpu.memory_space<vmem>>, vector<1x256xf32>
    %6 = vector.broadcast %5 : vector<1x256xf32> to vector<192x256xf32>
    %7 = arith.addf %4, %6 : vector<192x256xf32>
    %c0_5 = arith.constant 0 : index
    %c0_6 = arith.constant 0 : index
    %8 = vector.load %arg4[%c0_5, %c0_6] : memref<192x256xf32, #tpu.memory_space<vmem>>, vector<192x256xf32>
    tpu.vector_store %arg4[%c0_5, %c0_6], %7 {strides = array<i32>} : memref<192x256xf32, #tpu.memory_space<vmem>>, vector<192x256xf32>,
    return
  }
  func.func @transform_0(%arg0: i32) -> (i32, i32) {
    %c0_i32 = arith.constant 0 : i32
    %c0_i32_0 = arith.constant 0 : i32
    return %arg0, %c0_i32 : i32, i32
  }
  func.func @transform_1(%arg0: i32) -> (i32, i32) {
    %c0_i32 = arith.constant 0 : i32
    %c0_i32_0 = arith.constant 0 : i32
    %c0_i32_1 = arith.constant 0 : i32
    return %c0_i32, %c0_i32_0 : i32, i32
  }
  func.func @transform_2(%arg0: i32) -> (i32, i32) {
    %c0_i32 = arith.constant 0 : i32
    %c0_i32_0 = arith.constant 0 : i32
    %c0_i32_1 = arith.constant 0 : i32
    return %c0_i32, %c0_i32_0 : i32, i32
  }
  func.func @transform_3(%arg0: i32) -> (i32, i32) {
    %c0_i32 = arith.constant 0 : i32
    %c0_i32_0 = arith.constant 0 : i32
    return %arg0, %c0_i32 : i32, i32
  }
}

</mosaic_0001>

<bundles_post_ra>
// kernel: _embedding_reducer_pallas.1
= control target key start
LH: loop header
LB: loop body
LE: loop exit
PB: predicated region body
PF: predicated region fallthrough
CT: control target
= control target key end

     0   :  { %8 = vsyncpa [#allocation3], 0  ;;  %s2435_s0 = inlined_call_operand.hbm [shape: f32[384,768], index: 0, kind: input, shape index: {}]   ;;  %s2436_s1 = inlined_call_operand.hbm [shape: f32[768,256], index: 1, kind: input, shape index: {}]   ;;  %s2437_s2 = inlined_call_operand.hbm [shape: f32[1,256], index: 2, kind: input, shape index: {}]   ;;  %s2438_s3 = inlined_call_operand.hbm [shape: f32[384,256], index: 3, kind: output, shape index: {}]  }
   0x1   :  { %10 = vsyncpa [#allocation3 + $0x1], 0 }
   0x2   :  { %11 = vsyncpa [#allocation6], 0 }
   0x3   :  { %12 = vsyncpa [#allocation4], 0 }
   0x4   :  { %14 = vsyncpa [#allocation4 + $0x1], 0  ;;  %s1807_s12 = smov 0   ;;  %s1809_s13 = smov 0  }
   0x5   :  { %s1811_s14 = smov 0   ;;  %s1813_s15 = smov 0  }
   0x6 LB: > { %s1828_s16 = sadd.s32 4294967295, %s1775_s15   ;;  %s1349_s17 = sadd.s32 4294967294, %s1775_s15   ;;  %s1775_s15 = sphi %s1813_s15, %s2458_s15   ;;  %s1771_s14 = sphi %s1811_s14, %s2457_s14   ;;  %s1767_s13 = sphi %s1809_s13, %s2456_s13   ;;  %s1763_s12 = sphi %s1807_s12, %s2455_s12  }
   0x7   : > { %p40_p0 = scmp.ne.s32.totalorder %s1767_s13, %s1763_s12  ;;  %p2439_p1 = scmp.eq.s32.totalorder %s1828_s16, 0 }
   0x8   : > { %p112_p3 = scmp.eq.s32.totalorder %s1349_s17, 1  ;;  %p1350_p5 = scmp.ge.s32.totalorder %s1775_s15, 1 }
   0x9   : > { %p1837_p4 = por %p2439_p1, %p40_p0  ;;  %p119_p7 = scmp.lt.s32.totalorder %s1775_s15, 3 }
   0xa   : > { %p1842_p6 = por %p112_p3, %p40_p0  ;;  %s1777_s21 = smov [#allocation5]  }
   0xb   : > { %s2442_s18 = scalar_select %p1837_p4, 1, 0 }
   0xc   : > { %s2443_s19 = scalar_select %p1842_p6, 1, 0 }
   0xd   : > { %p1847_p8 = pnand %p1350_p5, %p119_p7  ;;  %s131_s22 = sshll.u32 %s1777_s21, 4  ;;  %s1851_s22 = int_to_ptr.vmem [resolvable:$true] %s131_s22 }
   0xe   : > { %s1778_s24 = smov [#allocation7]   ;;  %s1619_s28 = scalar_lea.hbm %s2436_s1, 24576 }
   0xf   : > { %p1557_p9 = pneg %p1847_p8  ;;  %s145_s25 = sshll.u32 %s1778_s24, 4  ;;  %s1862_s25 = int_to_ptr.vmem [resolvable:$true] %s145_s25 }
  0x10   : > { %p1620_p12 = scmp.ne.s32.totalorder %s2436_s1, %s1619_s28  ;;  %p1626_p5 = scmp.lt.u32.totalorder %s1619_s28, %s2436_s1 }
  0x11   : > { %p1858_p11 = pnand %p1557_p9, %p2439_p1 }
  0x13   : > { %p1621_p13 = pneg %p1858_p11 }
  0x15   : > { %p1622_p0 = pnand %p1621_p13, %p1620_p12 }
  0x17   : > { %p1623_p3 = pneg %p1622_p0 }
  0x19   : > { %p1628_p7 = pnand %p1626_p5, %p1623_p3 }
  0x1b   : > { %1631 = shalt.err (!%p1628_p7)
}
  0x1c   : > { %s1632_s6 = scalar_lea.vmem %s1851_s22, 24576  ;;  %p1640_p2 = scmp.lt.s32.totalorder %s1851_s22, %s1851_s22 }
  0x1d   : > { %p1633_p9 = scmp.ne.s32.totalorder %s1851_s22, %s1632_s6  ;;  %p1641_p12 = scmp.lt.s32.totalorder %s1632_s6, %s1632_s6 }
  0x1f   : > { %p1635_p10 = pnand %p1633_p9, %p1621_p13  ;;  %p1642_p0 = por %p1641_p12, %p1640_p2 }
  0x21   : > { %p1636_p1 = pneg %p1635_p10 }
  0x23   : > { %p1643_p6 = pnand %p1642_p0, %p1636_p1 }
  0x25   : > { %1646 = shalt.err (!%p1643_p6)
}
  0x26   : > { %s1779_s7 = smov 256   ;;  %s1780_s8 = smov 16  }
  0x27   : > { %1560 = dma.hbm_to_vmem [thread:$0]  (!%p1858_p11), %s2436_s1, 24576, %s1851_s22, [#allocation6], %s1779_s7, %s1779_s7, %s1780_s8  }
  0x28   : > { %s1647_s21 = scalar_lea.hbm %s2437_s2, 32 }
  0x29   : > { %p1648_p2 = scmp.ne.s32.totalorder %s2437_s2, %s1647_s21  ;;  %p1654_p10 = scmp.lt.u32.totalorder %s1647_s21, %s2437_s2 }
  0x2b   : > { %p1650_p1 = pnand %p1648_p2, %p1621_p13 }
  0x2d   : > { %p1651_p6 = pneg %p1650_p1 }
  0x2f   : > { %p1656_p3 = pnand %p1654_p10, %p1651_p6 }
  0x31   : > { %1659 = shalt.err (!%p1656_p3)
}
  0x32   : > { %s1660_s22 = scalar_lea.vmem %s1862_s25, 32  ;;  %p1668_p12 = scmp.lt.s32.totalorder %s1862_s25, %s1862_s25 }
  0x33   : > { %p1661_p5 = scmp.ne.s32.totalorder %s1862_s25, %s1660_s22  ;;  %p1669_p0 = scmp.lt.s32.totalorder %s1660_s22, %s1660_s22 }
  0x35   : > { %p1663_p7 = pnand %p1661_p5, %p1621_p13  ;;  %p1670_p2 = por %p1669_p0, %p1668_p12 }
  0x37   : > { %p1664_p9 = pneg %p1663_p7 }
  0x39   : > { %p1671_p1 = pnand %p1670_p2, %p1664_p9 }
  0x3b   : > { %1674 = shalt.err (!%p1671_p1)
}
  0x3c   : > { %1563 = dma.hbm_to_vmem [thread:$0]  (!%p1858_p11), %s2437_s2, 32, %s1862_s25, [#allocation6]  }
  0x3d   : > { %s1917_s4 = sadd.s32 1, %s1775_s15   ;;  %s27_s5 = sadd.s32 1, %s1771_s14 }
  0x3e   : > { %s24_s23 = ssub.s32 %s1775_s15, %s1917_s4  ;;  %p34_p6 = scmp.ne.s32.totalorder %s1771_s14, %s1767_s13 }
  0x3f   : > { %p25_p13 = scmp.eq.s32.totalorder %s24_s23, 0  ;;  %p35_p10 = scmp.eq.s32.totalorder %s1775_s15, 0 }
  0x40   : > { %p1574_p3 = scmp.lt.s32.totalorder %s1775_s15, 2  ;;  %p2446_p7 = scmp.eq.s32.totalorder %s1828_s16, 1 }
  0x41   : > { %s1927_s6 = scalar_select %p25_p13, %s1771_s14, %s27_s5  }
  0x42   : > { %p36_p5 = por %p35_p10, %p34_p6  ;;  %p1931_p9 = por %p2446_p7, %p34_p6 }
  0x43   : > { %s156_s8 = sand.u32 1, %s1771_s14   ;;  %s1575_s9 = smul.u32 18432, %s1775_s15 }
  0x44   : > { %s2447_s7 = scalar_select %p1931_p9, 1, 0 }
  0x45   : > { %s1541_s25 = smul.u32 1152, %s156_s8  ;;  %s1940_s17 = scalar_lea.hbm %s2435_s0, %s1575_s9 }
  0x46   : > { %p1942_p11 = pnand %p1574_p3, %p36_p5  ;;  %s1948_s27 = scalar_lea.sflag [#allocation3], %s156_s8 }
  0x47   : > { %s160_s24 = scalar_lea.vmem [#allocation2], %s1541_s25  ;;  %s1675_s28 = scalar_lea.hbm %s1940_s17, 18432 }
  0x48   : > { %s168_s26 = sshll.u32 %s160_s24, 4  ;;  %p1676_p12 = scmp.ne.s32.totalorder %s1940_s17, %s1675_s28  ;;  %s1946_s26 = int_to_ptr.vmem [resolvable:$true] %s168_s26 }
  0x49   : > { %p1677_p0 = pneg %p1942_p11  ;;  %s1680_s30 = scalar_lea.hbm %s2435_s0, 36864 }
  0x4a   : > { %p1681_p13 = scmp.lt.u32.totalorder %s1940_s17, %s2435_s0  ;;  %p1682_p6 = scmp.lt.u32.totalorder %s1680_s30, %s1675_s28 }
  0x4b   : > { %p1678_p2 = pnand %p1677_p0, %p1676_p12  ;;  %p1684_p3 = scmp.lt.u32.totalorder %s1675_s28, %s1940_s17 }
  0x4c   : > { %p1683_p10 = por %p1682_p6, %p1681_p13 }
  0x4d   : > { %p1679_p1 = pneg %p1678_p2 }
  0x4e   : > { %p1685_p5 = por %p1684_p3, %p1683_p10 }
  0x50   : > { %p1686_p7 = pnand %p1685_p5, %p1679_p1 }
  0x52   : > { %1689 = shalt.err (!%p1686_p7)
}
  0x53   : > { %s1690_s8 = scalar_lea.vmem %s1946_s26, 18432  ;;  %s1781_s9 = smov [#allocation2]  }
  0x54   : > { %p1691_p12 = scmp.ne.s32.totalorder %s1946_s26, %s1690_s8  ;;  %s1695_s25 = sshll.u32 %s1781_s9, 4  ;;  %s1696_s25 = int_to_ptr.vmem [resolvable:$false] %s1695_s25 }
  0x55   : > { %s1697_s10 = scalar_lea.vmem %s1696_s25, 36864  ;;  %p1698_p4 = scmp.lt.s32.totalorder %s1946_s26, %s1696_s25 }
  0x56   : > { %p1693_p2 = pnand %p1691_p12, %p1677_p0  ;;  %p1699_p13 = scmp.lt.s32.totalorder %s1697_s10, %s1690_s8 }
  0x58   : > { %p1694_p9 = pneg %p1693_p2  ;;  %p1700_p6 = por %p1699_p13, %p1698_p4 }
  0x5a   : > { %p1701_p10 = pnand %p1700_p6, %p1694_p9 }
  0x5c   : > { %1704 = shalt.err (!%p1701_p10)
}
  0x5d   : > { %s1782_s11 = smov 768   ;;  %s1783_s24 = smov 48  }
  0x5e   : > { %1567 = dma.hbm_to_vmem [thread:$0]  (!%p1942_p11), %s1940_s17, 18432, %s1946_s26, %s1948_s27, %s1782_s11, %s1782_s11, %s1783_s24  }
  0x5f   : > { %180 = sbr.rel (%p1847_p8) target bundleno = 543 (0x21f), region = 32  ;;  %s1979_s28 = sand.u32 (!%p1847_p8), 1, %s1767_s13  }
  0x60   : > { %s1543_s22 = smul.u32 (!%p1847_p8), 1152, %s1979_s28  ;;  %s183_s29 = scalar_lea.sflag (!%p1847_p8), [#allocation3], %s1979_s28 }
  0x61   : > { %p2449_p4 = scmp.ne.s32.totalorder (!%p1847_p8), %s2442_s18, 0 }
  0x62   : > { %s1983_s30 = scalar_lea.vmem (!%p1847_p8), [#allocation2], %s1543_s22 }
  0x66   : > { %1750 = dma.done.wait (%p2449_p4), %s183_s29, 18432  }
  0x67   : > { %1752 = vsyncadd (%p2449_p4), %s183_s29, 4294948864  ;;  %p2450_p9 = scmp.eq.s32.totalorder %s1828_s16, 0 }
  0x69   : > { %1754 = dma.done.wait (%p2450_p9), [#allocation6], 24608   ;;  %p2451_p8 = pmov %p2450_p9 }
  0x6a   : > { %v436_v0 = vld [vmem:[#allocation5 + $0x8] sm:$0xff]  ;;  %v438_v1 = vld [vmem:[#allocation5 + $0x18] sm:$0xff]  ;;  %v435_v5 = vld [vmem:[#allocation5] sm:$0xff]  ;;  %s1544_s18 = smul.u32 384, %s1979_s28  ;;  %s1243_s23 = scalar_lea.sflag [#allocation4], %s1979_s28 }
  0x6b   : > { %1756 = vsyncadd (%p2451_p8), [#allocation6], 4294942688  ;;  %v500_v2 = vld [vmem:[#allocation5 + $0x208] sm:$0xff]  ;;  %v628_v3 = vpack.c.bf16 %v438_v1, %v436_v0  ;;  %v502_v4 = vld [vmem:[#allocation5 + $0x218] sm:$0xff]  ;;  %s1364_s17 = smul.u32 6144, %s1828_s16  ;;  %p2452_p0 = scmp.ne.s32.totalorder %s2447_s7, 0 }
  0x6c   : > { %v437_v6 = vld [vmem:[#allocation5 + $0x10] sm:$0xff]  ;;  %v660_v7 = vpack.c.bf16 %v502_v4, %v500_v2  ;;  %v499_v9 = vld [vmem:[#allocation5 + $0x200] sm:$0xff]  ;;  %v440_v11 = vld [vmem:[#allocation5 + $0x28] sm:$0xff]  ;;  %s2272_s20 = scalar_lea.vmem [#allocation8], %s1544_s18  ;;  %s1784_s8 = smov [#allocation8]  }
  0x6d   : > { %v627_v8 = vpack.c.bf16 %v437_v6, %v435_v5  ;;  %v501_v10 = vld [vmem:[#allocation5 + $0x210] sm:$0xff]  ;;  %735 = vmatprep.subr.bf16.mxu1 %v628_v3  ;;  %v442_v13 = vld [vmem:[#allocation5 + $0x38] sm:$0xff]  ;;  %v504_v14 = vld [vmem:[#allocation5 + $0x228] sm:$0xff]  ;;  %s1257_s21 = sshll.u32 %s2272_s20, 4  ;;  %s2384_s27 = scalar_lea.hbm %s2438_s3, %s1364_s17  ;;  %s2386_s21 = int_to_ptr.vmem [resolvable:$true] %s1257_s21 }
  0x6e   : > { %v659_v12 = vpack.c.bf16 %v501_v10, %v499_v9  ;;  %v506_v15 = vld [vmem:[#allocation5 + $0x238] sm:$0xff]  ;;  %888 = vmatprep.subr.bf16.mxu0 %v660_v7  ;;  %v630_v16 = vpack.c.bf16 %v442_v13, %v440_v11  ;;  %v439_v18 = vld [vmem:[#allocation5 + $0x20] sm:$0xff]  ;;  %v441_v19 = vld [vmem:[#allocation5 + $0x30] sm:$0xff]  ;;  %s1705_s5 = scalar_lea.vmem %s2386_s21, 6144  ;;  %s1709_s9 = sshll.u32 %s1784_s8, 4  ;;  %s1710_s9 = int_to_ptr.vmem [resolvable:$false] %s1709_s9 }
  0x6f   : > { %736 = vmatpush1.bf16.msra.mxu1 %v627_v8  ;;  %v662_v17 = vpack.c.bf16 %v506_v15, %v504_v14  ;;  %v503_v20 = vld [vmem:[#allocation5 + $0x220] sm:$0xff]  ;;  %v629_v21 = vpack.c.bf16 %v441_v19, %v439_v18  ;;  %v505_v22 = vld [vmem:[#allocation5 + $0x230] sm:$0xff]  ;;  %v444_v23 = vld [vmem:[#allocation5 + $0x48] sm:$0xff]  ;;  %p1706_p11 = scmp.ne.s32.totalorder %s2386_s21, %s1705_s5  ;;  %s1711_s25 = scalar_lea.vmem %s1710_s9, 12288 }
  0x70   : > { %889 = vmatpush1.bf16.msra.mxu0 %v659_v12  ;;  %v446_v24 = vld [vmem:[#allocation5 + $0x58] sm:$0xff]  ;;  %737 = vmatprep.subr.bf16.mxu1 %v630_v16  ;;  %v661_v25 = vpack.c.bf16 %v505_v22, %v503_v20  ;;  %v508_v27 = vld [vmem:[#allocation5 + $0x248] sm:$0xff]  ;;  %v443_v29 = vld [vmem:[#allocation5 + $0x40] sm:$0xff]  ;;  %p1712_p5 = scmp.lt.s32.totalorder %s2386_s21, %s1710_s9  ;;  %p1713_p7 = scmp.lt.s32.totalorder %s1711_s25, %s1705_s5 }
  0x71   : > { %890 = vmatprep.subr.bf16.mxu0 %v662_v17  ;;  %v632_v26 = vpack.c.bf16 %v446_v24, %v444_v23  ;;  %v510_v28 = vld [vmem:[#allocation5 + $0x258] sm:$0xff]  ;;  %v445_v31 = vld [vmem:[#allocation5 + $0x50] sm:$0xff]  ;;  %v507_v32 = vld [vmem:[#allocation5 + $0x240] sm:$0xff]  ;;  %p1707_p1 = pnand %p1706_p11, %p2452_p0 }
  0x72   : > { %v664_v30 = vpack.c.bf16 %v510_v28, %v508_v27  ;;  %v509_v33 = vld [vmem:[#allocation5 + $0x250] sm:$0xff]  ;;  %v631_v34 = vpack.c.bf16 %v445_v31, %v443_v29  ;;  %v448_v35 = vld [vmem:[#allocation5 + $0x68] sm:$0xff]  ;;  %v450_v36 = vld [vmem:[#allocation5 + $0x78] sm:$0xff]  ;;  %p1714_p12 = por %p1713_p7, %p1712_p5 }
  0x73   : > { %738 = vmatpush1.bf16.msra.mxu1 %v629_v21  ;;  %v512_v37 = vld [vmem:[#allocation5 + $0x268] sm:$0xff]  ;;  %v663_v38 = vpack.c.bf16 %v509_v33, %v507_v32  ;;  %v634_v39 = vpack.c.bf16 %v450_v36, %v448_v35  ;;  %v514_v40 = vld [vmem:[#allocation5 + $0x278] sm:$0xff]  ;;  %v447_v41 = vld [vmem:[#allocation5 + $0x60] sm:$0xff]  ;;  %p1708_p3 = pneg %p1707_p1 }
  0x74   : > { %891 = vmatpush1.bf16.msra.mxu0 %v661_v25  ;;  %739 = vmatprep.subr.bf16.mxu1 %v632_v26  ;;  %v449_v42 = vld [vmem:[#allocation5 + $0x70] sm:$0xff]  ;;  %v666_v43 = vpack.c.bf16 %v514_v40, %v512_v37  ;;  %v511_v44 = vld [vmem:[#allocation5 + $0x260] sm:$0xff]  ;;  %v452_v46 = vld [vmem:[#allocation5 + $0x88] sm:$0xff] }
  0x75   : > { %892 = vmatprep.subr.bf16.mxu0 %v664_v30  ;;  %v513_v45 = vld [vmem:[#allocation5 + $0x270] sm:$0xff]  ;;  %v454_v47 = vld [vmem:[#allocation5 + $0x98] sm:$0xff]  ;;  %v516_v48 = vld [vmem:[#allocation5 + $0x288] sm:$0xff]  ;;  %v633_v50 = vpack.c.bf16 %v449_v42, %v447_v41  ;;  %p1715_p2 = pnand %p1714_p12, %p1708_p3 }
  0x76   : > { %v518_v49 = vld [vmem:[#allocation5 + $0x298] sm:$0xff]  ;;  %v665_v51 = vpack.c.bf16 %v513_v45, %v511_v44  ;;  %v636_v52 = vpack.c.bf16 %v454_v47, %v452_v46  ;;  %v451_v53 = vld [vmem:[#allocation5 + $0x80] sm:$0xff]  ;;  %v453_v54 = vld [vmem:[#allocation5 + $0x90] sm:$0xff] }
  0x77   : > { %740 = vmatpush1.bf16.msra.mxu1 %v631_v34  ;;  %v515_v55 = vld [vmem:[#allocation5 + $0x280] sm:$0xff]  ;;  %v668_v56 = vpack.c.bf16 %v518_v49, %v516_v48  ;;  %v517_v57 = vld [vmem:[#allocation5 + $0x290] sm:$0xff]  ;;  %v456_v58 = vld [vmem:[#allocation5 + $0xa8] sm:$0xff]  ;;  %v635_v62 = vpack.c.bf16 %v453_v54, %v451_v53 }
  0x78   : > { %893 = vmatpush1.bf16.msra.mxu0 %v663_v38  ;;  %741 = vmatprep.subr.bf16.mxu1 %v634_v39  ;;  %v458_v59 = vld [vmem:[#allocation5 + $0xb8] sm:$0xff]  ;;  %v520_v60 = vld [vmem:[#allocation5 + $0x2a8] sm:$0xff]  ;;  %v667_v63 = vpack.c.bf16 %v517_v57, %v515_v55  ;;  %v455_v1 = vld [vmem:[#allocation5 + $0xa0] sm:$0xff] }
  0x79   : > { %894 = vmatprep.subr.bf16.mxu0 %v666_v43  ;;  %v522_v61 = vld [vmem:[#allocation5 + $0x2b8] sm:$0xff]  ;;  %v638_v0 = vpack.c.bf16 %v458_v59, %v456_v58  ;;  %v457_v2 = vld [vmem:[#allocation5 + $0xb0] sm:$0xff]  ;;  %v519_v3 = vld [vmem:[#allocation5 + $0x2a0] sm:$0xff] }
  0x7a   : > { %v670_v4 = vpack.c.bf16 %v522_v61, %v520_v60  ;;  %v521_v5 = vld [vmem:[#allocation5 + $0x2b0] sm:$0xff]  ;;  %v460_v6 = vld [vmem:[#allocation5 + $0xc8] sm:$0xff]  ;;  %v462_v7 = vld [vmem:[#allocation5 + $0xd8] sm:$0xff]  ;;  %v637_v10 = vpack.c.bf16 %v457_v2, %v455_v1 }
  0x7b   : > { %742 = vmatpush1.bf16.msra.mxu1 %v633_v50  ;;  %v524_v8 = vld [vmem:[#allocation5 + $0x2c8] sm:$0xff]  ;;  %v526_v9 = vld [vmem:[#allocation5 + $0x2d8] sm:$0xff]  ;;  %v669_v11 = vpack.c.bf16 %v521_v5, %v519_v3  ;;  %v640_v12 = vpack.c.bf16 %v462_v7, %v460_v6  ;;  %v459_v13 = vld [vmem:[#allocation5 + $0xc0] sm:$0xff] }
  0x7c   : > { %895 = vmatpush1.bf16.msra.mxu0 %v665_v51  ;;  %743 = vmatprep.subr.bf16.mxu1 %v636_v52  ;;  %v461_v14 = vld [vmem:[#allocation5 + $0xd0] sm:$0xff]  ;;  %v523_v15 = vld [vmem:[#allocation5 + $0x2c0] sm:$0xff]  ;;  %v672_v16 = vpack.c.bf16 %v526_v9, %v524_v8  ;;  %v464_v18 = vld [vmem:[#allocation5 + $0xe8] sm:$0xff] }
  0x7d   : > { %896 = vmatprep.subr.bf16.mxu0 %v668_v56  ;;  %v525_v17 = vld [vmem:[#allocation5 + $0x2d0] sm:$0xff]  ;;  %v466_v19 = vld [vmem:[#allocation5 + $0xf8] sm:$0xff]  ;;  %v528_v20 = vld [vmem:[#allocation5 + $0x2e8] sm:$0xff]  ;;  %v639_v22 = vpack.c.bf16 %v461_v14, %v459_v13 }
  0x7e   : > { %v530_v21 = vld [vmem:[#allocation5 + $0x2f8] sm:$0xff]  ;;  %v671_v23 = vpack.c.bf16 %v525_v17, %v523_v15  ;;  %v642_v24 = vpack.c.bf16 %v466_v19, %v464_v18  ;;  %v463_v25 = vld [vmem:[#allocation5 + $0xe0] sm:$0xff]  ;;  %v465_v26 = vld [vmem:[#allocation5 + $0xf0] sm:$0xff] }
  0x7f   : > { %744 = vmatpush1.bf16.msra.mxu1 %v635_v62  ;;  %v527_v27 = vld [vmem:[#allocation5 + $0x2e0] sm:$0xff]  ;;  %v674_v28 = vpack.c.bf16 %v530_v21, %v528_v20  ;;  %v529_v29 = vld [vmem:[#allocation5 + $0x2f0] sm:$0xff]  ;;  %v468_v30 = vld [vmem:[#allocation5 + $0x108] sm:$0xff]  ;;  %v641_v34 = vpack.c.bf16 %v465_v26, %v463_v25 }
  0x80   : > { %897 = vmatpush1.bf16.msra.mxu0 %v667_v63  ;;  %745 = vmatprep.subr.bf16.mxu1 %v638_v0  ;;  %v470_v31 = vld [vmem:[#allocation5 + $0x118] sm:$0xff]  ;;  %v532_v32 = vld [vmem:[#allocation5 + $0x308] sm:$0xff]  ;;  %v673_v35 = vpack.c.bf16 %v529_v29, %v527_v27  ;;  %v467_v37 = vld [vmem:[#allocation5 + $0x100] sm:$0xff] }
  0x81   : > { %898 = vmatprep.subr.bf16.mxu0 %v670_v4  ;;  %v534_v33 = vld [vmem:[#allocation5 + $0x318] sm:$0xff]  ;;  %v644_v36 = vpack.c.bf16 %v470_v31, %v468_v30  ;;  %v469_v38 = vld [vmem:[#allocation5 + $0x110] sm:$0xff]  ;;  %v531_v39 = vld [vmem:[#allocation5 + $0x300] sm:$0xff] }
  0x82   : > { %v676_v40 = vpack.c.bf16 %v534_v33, %v532_v32  ;;  %v533_v41 = vld [vmem:[#allocation5 + $0x310] sm:$0xff]  ;;  %v472_v42 = vld [vmem:[#allocation5 + $0x128] sm:$0xff]  ;;  %v474_v43 = vld [vmem:[#allocation5 + $0x138] sm:$0xff]  ;;  %v643_v46 = vpack.c.bf16 %v469_v38, %v467_v37 }
  0x83   : > { %746 = vmatpush1.bf16.msra.mxu1 %v637_v10  ;;  %v536_v44 = vld [vmem:[#allocation5 + $0x328] sm:$0xff]  ;;  %v538_v45 = vld [vmem:[#allocation5 + $0x338] sm:$0xff]  ;;  %v675_v47 = vpack.c.bf16 %v533_v41, %v531_v39  ;;  %v646_v48 = vpack.c.bf16 %v474_v43, %v472_v42  ;;  %v471_v49 = vld [vmem:[#allocation5 + $0x120] sm:$0xff] }
  0x84   : > { %899 = vmatpush1.bf16.msra.mxu0 %v669_v11  ;;  %747 = vmatprep.subr.bf16.mxu1 %v640_v12  ;;  %v473_v50 = vld [vmem:[#allocation5 + $0x130] sm:$0xff]  ;;  %v535_v51 = vld [vmem:[#allocation5 + $0x320] sm:$0xff]  ;;  %v678_v52 = vpack.c.bf16 %v538_v45, %v536_v44  ;;  %v476_v54 = vld [vmem:[#allocation5 + $0x148] sm:$0xff] }
  0x85   : > { %900 = vmatprep.subr.bf16.mxu0 %v672_v16  ;;  %v537_v53 = vld [vmem:[#allocation5 + $0x330] sm:$0xff]  ;;  %v478_v55 = vld [vmem:[#allocation5 + $0x158] sm:$0xff]  ;;  %v540_v56 = vld [vmem:[#allocation5 + $0x348] sm:$0xff]  ;;  %v645_v58 = vpack.c.bf16 %v473_v50, %v471_v49 }
  0x86   : > { %v542_v57 = vld [vmem:[#allocation5 + $0x358] sm:$0xff]  ;;  %v677_v59 = vpack.c.bf16 %v537_v53, %v535_v51  ;;  %v648_v60 = vpack.c.bf16 %v478_v55, %v476_v54  ;;  %v475_v61 = vld [vmem:[#allocation5 + $0x140] sm:$0xff]  ;;  %v477_v62 = vld [vmem:[#allocation5 + $0x150] sm:$0xff] }
  0x87   : > { %748 = vmatpush1.bf16.msra.mxu1 %v639_v22  ;;  %v539_v63 = vld [vmem:[#allocation5 + $0x340] sm:$0xff]  ;;  %v680_v0 = vpack.c.bf16 %v542_v57, %v540_v56  ;;  %v541_v1 = vld [vmem:[#allocation5 + $0x350] sm:$0xff]  ;;  %v480_v2 = vld [vmem:[#allocation5 + $0x168] sm:$0xff]  ;;  %v647_v6 = vpack.c.bf16 %v477_v62, %v475_v61 }
  0x88   : > { %901 = vmatpush1.bf16.msra.mxu0 %v671_v23  ;;  %749 = vmatprep.subr.bf16.mxu1 %v642_v24  ;;  %v482_v3 = vld [vmem:[#allocation5 + $0x178] sm:$0xff]  ;;  %v544_v4 = vld [vmem:[#allocation5 + $0x368] sm:$0xff]  ;;  %v479_v7 = vld [vmem:[#allocation5 + $0x160] sm:$0xff]  ;;  %v679_v10 = vpack.c.bf16 %v541_v1, %v539_v63 }
  0x89   : > { %902 = vmatprep.subr.bf16.mxu0 %v674_v28  ;;  %v546_v5 = vld [vmem:[#allocation5 + $0x378] sm:$0xff]  ;;  %v481_v8 = vld [vmem:[#allocation5 + $0x170] sm:$0xff]  ;;  %v543_v9 = vld [vmem:[#allocation5 + $0x360] sm:$0xff]  ;;  %v650_v11 = vpack.c.bf16 %v482_v3, %v480_v2 }
  0x8a   : > { %v545_v12 = vld [vmem:[#allocation5 + $0x370] sm:$0xff]  ;;  %v484_v13 = vld [vmem:[#allocation5 + $0x188] sm:$0xff]  ;;  %v486_v14 = vld [vmem:[#allocation5 + $0x198] sm:$0xff]  ;;  %v682_v15 = vpack.c.bf16 %v546_v5, %v544_v4  ;;  %v649_v22 = vpack.c.bf16 %v481_v8, %v479_v7 }
  0x8b   : > { %750 = vmatpush1.bf16.msra.mxu1 %v641_v34  ;;  %v548_v16 = vld [vmem:[#allocation5 + $0x388] sm:$0xff]  ;;  %v550_v17 = vld [vmem:[#allocation5 + $0x398] sm:$0xff]  ;;  %v681_v25 = vpack.c.bf16 %v545_v12, %v543_v9  ;;  %v652_v26 = vpack.c.bf16 %v486_v14, %v484_v13  ;;  %v483_v27 = vld [vmem:[#allocation5 + $0x180] sm:$0xff] }
  0x8c   : > { %903 = vmatpush1.bf16.msra.mxu0 %v673_v35  ;;  %751 = vmatprep.subr.bf16.mxu1 %v644_v36  ;;  %v220_v18 = vld [vmem:[%s1983_s30 + $0x8] sm:$0xff]  ;;  %v226_v19 = vld [vmem:[%s1983_s30 + $0x38] sm:$0xff]  ;;  %v485_v28 = vld [vmem:[#allocation5 + $0x190] sm:$0xff]  ;;  %v684_v30 = vpack.c.bf16 %v550_v17, %v548_v16 }
  0x8d   : > { %904 = vmatprep.subr.bf16.mxu0 %v676_v40  ;;  %v222_v20 = vld [vmem:[%s1983_s30 + $0x18] sm:$0xff]  ;;  %v228_v21 = vld [vmem:[%s1983_s30 + $0x48] sm:$0xff]  ;;  %v364_v23 = vpack.c.bf16 %v226_v19, %v220_v18  ;;  %v547_v29 = vld [vmem:[#allocation5 + $0x380] sm:$0xff]  ;;  %v651_v36 = vpack.c.bf16 %v485_v28, %v483_v27 }
  0x8e   : > { %v366_v24 = vpack.c.bf16 %v228_v21, %v222_v20  ;;  %v549_v31 = vld [vmem:[#allocation5 + $0x390] sm:$0xff]  ;;  %v488_v32 = vld [vmem:[#allocation5 + $0x1a8] sm:$0xff]  ;;  %v490_v33 = vld [vmem:[#allocation5 + $0x1b8] sm:$0xff] }
  0x8f   : > { %752 = vmatpush1.bf16.msra.mxu1 %v643_v46  ;;  %767 = vmatprep.mubr.bf16.mxu1 %v364_v23  ;;  %v552_v34 = vld [vmem:[#allocation5 + $0x3a8] sm:$0xff]  ;;  %v554_v35 = vld [vmem:[#allocation5 + $0x3b8] sm:$0xff]  ;;  %v683_v37 = vpack.c.bf16 %v549_v31, %v547_v29  ;;  %v654_v38 = vpack.c.bf16 %v490_v33, %v488_v32  ;;  %v487_v39 = vld [vmem:[#allocation5 + $0x1a0] sm:$0xff] }
  0x90   : > { %905 = vmatpush1.bf16.msra.mxu0 %v675_v47  ;;  %753 = vmatprep.subr.bf16.mxu1 %v646_v48  ;;  %v489_v40 = vld [vmem:[#allocation5 + $0x1b0] sm:$0xff]  ;;  %v551_v41 = vld [vmem:[#allocation5 + $0x3a0] sm:$0xff]  ;;  %v686_v42 = vpack.c.bf16 %v554_v35, %v552_v34  ;;  %v492_v44 = vld [vmem:[#allocation5 + $0x1c8] sm:$0xff] }
  0x91   : > { %906 = vmatprep.subr.bf16.mxu0 %v678_v52  ;;  %920 = vmatprep.mubr.bf16.mxu0 %v366_v24  ;;  %v553_v43 = vld [vmem:[#allocation5 + $0x3b0] sm:$0xff]  ;;  %v494_v45 = vld [vmem:[#allocation5 + $0x1d8] sm:$0xff]  ;;  %v556_v46 = vld [vmem:[#allocation5 + $0x3c8] sm:$0xff]  ;;  %v653_v48 = vpack.c.bf16 %v489_v40, %v487_v39 }
  0x92   : > { %v558_v47 = vld [vmem:[#allocation5 + $0x3d8] sm:$0xff]  ;;  %v685_v49 = vpack.c.bf16 %v553_v43, %v551_v41  ;;  %v656_v50 = vpack.c.bf16 %v494_v45, %v492_v44  ;;  %v491_v51 = vld [vmem:[#allocation5 + $0x1c0] sm:$0xff]  ;;  %v493_v52 = vld [vmem:[#allocation5 + $0x1d0] sm:$0xff] }
  0x93   : > { %754 = vmatpush1.bf16.msra.mxu1 %v645_v58  ;;  %v555_v53 = vld [vmem:[#allocation5 + $0x3c0] sm:$0xff]  ;;  %v688_v54 = vpack.c.bf16 %v558_v47, %v556_v46  ;;  %v557_v55 = vld [vmem:[#allocation5 + $0x3d0] sm:$0xff]  ;;  %v496_v56 = vld [vmem:[#allocation5 + $0x1e8] sm:$0xff] }
  0x94   : > { %907 = vmatpush1.bf16.msra.mxu0 %v677_v59  ;;  %755 = vmatprep.subr.bf16.mxu1 %v648_v60  ;;  %v498_v57 = vld [vmem:[#allocation5 + $0x1f8] sm:$0xff]  ;;  %v560_v58 = vld [vmem:[#allocation5 + $0x3e8] sm:$0xff]  ;;  %v655_v60 = vpack.c.bf16 %v493_v52, %v491_v51  ;;  %v687_v61 = vpack.c.bf16 %v557_v55, %v555_v53  ;;  %v495_v63 = vld [vmem:[#allocation5 + $0x1e0] sm:$0xff] }
  0x95   : > { %908 = vmatprep.subr.bf16.mxu0 %v680_v0  ;;  %v562_v59 = vld [vmem:[#allocation5 + $0x3f8] sm:$0xff]  ;;  %v658_v62 = vpack.c.bf16 %v498_v57, %v496_v56  ;;  %v497_v0 = vld [vmem:[#allocation5 + $0x1f0] sm:$0xff]  ;;  %v559_v1 = vld [vmem:[#allocation5 + $0x3e0] sm:$0xff] }
  0x96   : > { %v690_v2 = vpack.c.bf16 %v562_v59, %v560_v58  ;;  %v561_v3 = vld [vmem:[#allocation5 + $0x3f0] sm:$0xff]  ;;  %v564_v4 = vld [vmem:[#allocation5 + $0x408] sm:$0xff]  ;;  %v566_v5 = vld [vmem:[#allocation5 + $0x418] sm:$0xff] }
  0x97   : > { %756 = vmatpush1.bf16.msra.mxu1 %v647_v6  ;;  %v657_v6 = vpack.c.bf16 %v497_v0, %v495_v63  ;;  %v219_v7 = vld [vmem:[%s1983_s30] sm:$0xff]  ;;  %v225_v8 = vld [vmem:[%s1983_s30 + $0x30] sm:$0xff]  ;;  %v692_v12 = vpack.c.bf16 %v566_v5, %v564_v4  ;;  %v570_v16 = vld [vmem:[#allocation5 + $0x438] sm:$0xff] }
  0x98   : > { %909 = vmatpush1.bf16.msra.mxu0 %v679_v10  ;;  %757 = vmatprep.subr.bf16.mxu1 %v650_v11  ;;  %v221_v9 = vld [vmem:[%s1983_s30 + $0x10] sm:$0xff]  ;;  %v689_v10 = vpack.c.bf16 %v561_v3, %v559_v1  ;;  %v227_v11 = vld [vmem:[%s1983_s30 + $0x40] sm:$0xff]  ;;  %v363_v17 = vpack.c.bf16 %v225_v8, %v219_v7  ;;  %v232_v18 = vld [vmem:[%s1983_s30 + $0x68] sm:$0xff] }
  0x99   : > { %910 = vmatprep.subr.bf16.mxu0 %v682_v15  ;;  %v563_v13 = vld [vmem:[#allocation5 + $0x400] sm:$0xff]  ;;  %v565_v14 = vld [vmem:[#allocation5 + $0x410] sm:$0xff]  ;;  %v568_v15 = vld [vmem:[#allocation5 + $0x428] sm:$0xff]  ;;  %v365_v20 = vpack.c.bf16 %v227_v11, %v221_v9 }
  0x9a   : > { %v238_v19 = vld [vmem:[%s1983_s30 + $0x98] sm:$0xff]  ;;  %v691_v21 = vpack.c.bf16 %v565_v14, %v563_v13  ;;  %v240_v23 = vld [vmem:[%s1983_s30 + $0xa8] sm:$0xff]  ;;  %v694_v24 = vpack.c.bf16 %v570_v16, %v568_v15  ;;  %v231_v32 = vld [vmem:[%s1983_s30 + $0x60] sm:$0xff] }
  0x9b   : > { %758 = vmatpush1.bf16.msra.mxu1 %v649_v22  ;;  %v234_v22 = vld [vmem:[%s1983_s30 + $0x78] sm:$0xff]  ;;  %v370_v27 = vpack.c.bf16 %v238_v19, %v232_v18  ;;  %v572_v28 = vld [vmem:[#allocation5 + $0x448] sm:$0xff]  ;;  %v237_v33 = vld [vmem:[%s1983_s30 + $0x90] sm:$0xff] }
  0x9c   : > { %911 = vmatpush1.bf16.msra.mxu0 %v681_v25  ;;  %759 = vmatprep.subr.bf16.mxu1 %v652_v26  ;;  %v567_v25 = vld [vmem:[#allocation5 + $0x420] sm:$0xff]  ;;  %v569_v26 = vld [vmem:[#allocation5 + $0x430] sm:$0xff]  ;;  %v574_v29 = vld [vmem:[#allocation5 + $0x458] sm:$0xff] }
  0x9d   : > { %912 = vmatprep.subr.bf16.mxu0 %v684_v30  ;;  %v372_v30 = vpack.c.bf16 %v240_v23, %v234_v22  ;;  %v693_v31 = vpack.c.bf16 %v569_v26, %v567_v25  ;;  %v233_v34 = vld [vmem:[%s1983_s30 + $0x70] sm:$0xff]  ;;  %v239_v35 = vld [vmem:[%s1983_s30 + $0xa0] sm:$0xff]  ;;  %v244_v39 = vld [vmem:[%s1983_s30 + $0xc8] sm:$0xff] }
  0x9e   : > { %v250_v40 = vld [vmem:[%s1983_s30 + $0xf8] sm:$0xff]  ;;  %v252_v43 = vld [vmem:[%s1983_s30 + $0x108] sm:$0xff]  ;;  %v371_v46 = vpack.c.bf16 %v239_v35, %v233_v34  ;;  %v243_v55 = vld [vmem:[%s1983_s30 + $0xc0] sm:$0xff] }
  0x9f   : > { %760 = vmatpush1.bf16.msra.mxu1 %v651_v36  ;;  %v696_v36 = vpack.c.bf16 %v574_v29, %v572_v28  ;;  %v246_v41 = vld [vmem:[%s1983_s30 + $0xd8] sm:$0xff]  ;;  %v576_v44 = vld [vmem:[#allocation5 + $0x468] sm:$0xff]  ;;  %v249_v56 = vld [vmem:[%s1983_s30 + $0xf0] sm:$0xff] }
  0xa0   : > { %913 = vmatpush1.bf16.msra.mxu0 %v683_v37  ;;  %761 = vmatprep.subr.bf16.mxu1 %v654_v38  ;;  %v571_v37 = vld [vmem:[#allocation5 + $0x440] sm:$0xff]  ;;  %v573_v38 = vld [vmem:[#allocation5 + $0x450] sm:$0xff]  ;;  %v578_v45 = vld [vmem:[#allocation5 + $0x478] sm:$0xff]  ;;  %v378_v51 = vpack.c.bf16 %v252_v43, %v246_v41  ;;  %v375_v3 = vpack.c.bf16 %v249_v56, %v243_v55 }
  0xa1   : > { %914 = vmatprep.subr.bf16.mxu0 %v686_v42  ;;  %v369_v42 = vpack.c.bf16 %v237_v33, %v231_v32  ;;  %v695_v47 = vpack.c.bf16 %v573_v38, %v571_v37  ;;  %v698_v52 = vpack.c.bf16 %v578_v45, %v576_v44  ;;  %v580_v53 = vld [vmem:[#allocation5 + $0x488] sm:$0xff]  ;;  %v245_v57 = vld [vmem:[%s1983_s30 + $0xd0] sm:$0xff]  ;;  %v251_v58 = vld [vmem:[%s1983_s30 + $0x100] sm:$0xff] }
  0xa2   : > { %v264_v0 = vld [vmem:[%s1983_s30 + $0x168] sm:$0xff]  ;;  %v579_v1 = vld [vmem:[#allocation5 + $0x480] sm:$0xff]  ;;  %v586_v5 = vld [vmem:[#allocation5 + $0x4b8] sm:$0xff] }
  0xa3   : > { %762 = vmatpush1.bf16.msra.mxu1 %v653_v48  ;;  %v376_v48 = vpack.c.bf16 %v250_v40, %v244_v39  ;;  %v584_v4 = vld [vmem:[#allocation5 + $0x4a8] sm:$0xff]  ;;  %v583_v11 = vld [vmem:[#allocation5 + $0x4a0] sm:$0xff]  ;;  %v590_v15 = vld [vmem:[#allocation5 + $0x4d8] sm:$0xff] }
  0xa4   : > { %915 = vmatpush1.bf16.msra.mxu0 %v685_v49  ;;  %763 = vmatprep.subr.bf16.mxu1 %v656_v50  ;;  %v575_v49 = vld [vmem:[#allocation5 + $0x460] sm:$0xff]  ;;  %v577_v50 = vld [vmem:[#allocation5 + $0x470] sm:$0xff]  ;;  %v588_v14 = vld [vmem:[#allocation5 + $0x4c8] sm:$0xff] }
  0xa5   : > { %916 = vmatprep.subr.bf16.mxu0 %v688_v54  ;;  %v582_v54 = vld [vmem:[#allocation5 + $0x498] sm:$0xff]  ;;  %v697_v59 = vpack.c.bf16 %v577_v50, %v575_v49  ;;  %v255_v13 = vld [vmem:[%s1983_s30 + $0x120] sm:$0xff]  ;;  %v261_v16 = vld [vmem:[%s1983_s30 + $0x150] sm:$0xff] }
  0xa6   : > { %v700_v63 = vpack.c.bf16 %v582_v54, %v580_v53  ;;  %v263_v18 = vld [vmem:[%s1983_s30 + $0x160] sm:$0xff]  ;;  %v268_v19 = vld [vmem:[%s1983_s30 + $0x188] sm:$0xff]  ;;  %v589_v26 = vld [vmem:[#allocation5 + $0x4d0] sm:$0xff] }
  0xa7   : > { %764 = vmatpush1.bf16.msra.mxu1 %v655_v60  ;;  %v256_v60 = vld [vmem:[%s1983_s30 + $0x128] sm:$0xff]  ;;  %v587_v25 = vld [vmem:[#allocation5 + $0x4c0] sm:$0xff]  ;;  %v594_v29 = vld [vmem:[#allocation5 + $0x4f8] sm:$0xff] }
  0xa8   : > { %917 = vmatpush1.bf16.msra.mxu0 %v687_v61  ;;  %765 = vmatprep.subr.bf16.mxu1 %v658_v62  ;;  %v262_v61 = vld [vmem:[%s1983_s30 + $0x158] sm:$0xff]  ;;  %v276_v23 = vld [vmem:[%s1983_s30 + $0x1c8] sm:$0xff]  ;;  %v703_v33 = vpack.c.bf16 %v589_v26, %v587_v25  ;;  %v591_v35 = vld [vmem:[#allocation5 + $0x4e0] sm:$0xff] }
  0xa9   : > { %918 = vmatprep.subr.bf16.mxu0 %v690_v2  ;;  %v258_v62 = vld [vmem:[%s1983_s30 + $0x138] sm:$0xff]  ;;  %v581_v2 = vld [vmem:[#allocation5 + $0x490] sm:$0xff]  ;;  %v382_v7 = vpack.c.bf16 %v262_v61, %v256_v60  ;;  %v592_v28 = vld [vmem:[#allocation5 + $0x4e8] sm:$0xff] }
  0xaa   : > { %v384_v8 = vpack.c.bf16 %v264_v0, %v258_v62  ;;  %v699_v9 = vpack.c.bf16 %v581_v2, %v579_v1  ;;  %v706_v34 = vpack.c.bf16 %v594_v29, %v592_v28  ;;  %v267_v37 = vld [vmem:[%s1983_s30 + $0x180] sm:$0xff]  ;;  %v596_v38 = vld [vmem:[#allocation5 + $0x508] sm:$0xff]  ;;  %v598_v39 = vld [vmem:[#allocation5 + $0x518] sm:$0xff] }
  0xab   : > { %766 = vmatpush1.bf16.msra.mxu1 %v657_v6  ;;  %v377_v6 = vpack.c.bf16 %v251_v58, %v245_v57  ;;  %v273_v40 = vld [vmem:[%s1983_s30 + $0x1b0] sm:$0xff]  ;;  %v280_v43 = vld [vmem:[%s1983_s30 + $0x1e8] sm:$0xff]  ;;  %v286_v44 = vld [vmem:[%s1983_s30 + $0x218] sm:$0xff] }
  0xac   : > { %919 = vmatpush1.bf16.msra.mxu0 %v689_v10  ;;  %1365 = vmatprep.subr.bf16.mxu1 %v692_v12  ;;  %v702_v10 = vpack.c.bf16 %v586_v5, %v584_v4  ;;  %v269_v41 = vld [vmem:[%s1983_s30 + $0x190] sm:$0xff]  ;;  %v282_v45 = vld [vmem:[%s1983_s30 + $0x1f8] sm:$0xff]  ;;  %v595_v49 = vld [vmem:[#allocation5 + $0x500] sm:$0xff]  ;;  %v394_v55 = vpack.c.bf16 %v286_v44, %v280_v43 }
  0xad   : > { %1041 = vmatprep.subr.bf16.mxu0 %v692_v12  ;;  %v585_v12 = vld [vmem:[#allocation5 + $0x4b0] sm:$0xff]  ;;  %v602_v53 = vld [vmem:[#allocation5 + $0x538] sm:$0xff]  ;;  %v279_v61 = vld [vmem:[%s1983_s30 + $0x1e0] sm:$0xff] }
  0xae   : > { %768 = vmatmul.mubr.bf16.vlgmr.msra.gmra.mrb[0].mxu1 %v363_v17  ;;  %v257_v17 = vld [vmem:[%s1983_s30 + $0x130] sm:$0xff]  ;;  %v701_v22 = vpack.c.bf16 %v585_v12, %v583_v11  ;;  %v604_v62 = vld [vmem:[#allocation5 + $0x548] sm:$0xff]  ;;  %v287_v2 = vld [vmem:[%s1983_s30 + $0x220] sm:$0xff] }
  0xaf   : > { %921 = vmatmul.mubr.bf16.vlgmr.msra.gmra.mrb[0].mxu0 %v365_v20  ;;  %1381 = vmatpush1.bf16.msra.mxu1 %v691_v21  ;;  %v274_v20 = vld [vmem:[%s1983_s30 + $0x1b8] sm:$0xff]  ;;  %v597_v50 = vld [vmem:[#allocation5 + $0x510] sm:$0xff]  ;;  %v608_v12 = vld [vmem:[#allocation5 + $0x568] sm:$0xff] }
  0xb0   : > { %1042 = vmatpush1.bf16.msra.mxu0 %v691_v21  ;;  %1366 = vmatprep.subr.bf16.mxu1 %v694_v24  ;;  %v270_v21 = vld [vmem:[%s1983_s30 + $0x198] sm:$0xff]  ;;  %v707_v57 = vpack.c.bf16 %v597_v50, %v595_v49  ;;  %v601_v60 = vld [vmem:[#allocation5 + $0x530] sm:$0xff]  ;;  %v299_v26 = vld [vmem:[%s1983_s30 + $0x280] sm:$0xff] }
  0xb1   : > { %1043 = vmatprep.subr.bf16.mxu0 %v694_v24  ;;  %777 = vmatprep.mubr.bf16.mxu1 %v370_v27  ;;  %v704_v24 = vpack.c.bf16 %v590_v15, %v588_v14  ;;  %v381_v27 = vpack.c.bf16 %v261_v16, %v255_v13  ;;  %v390_v32 = vpack.c.bf16 %v276_v23, %v270_v21  ;;  %v285_v0 = vld [vmem:[%s1983_s30 + $0x210] sm:$0xff]  ;;  %v298_v4 = vld [vmem:[%s1983_s30 + $0x278] sm:$0xff]  ;;  %v291_v21 = vld [vmem:[%s1983_s30 + $0x240] sm:$0xff] }
  0xb2   : > { %930 = vmatprep.mubr.bf16.mxu0 %v372_v30  ;;  %v383_v30 = vpack.c.bf16 %v263_v18, %v257_v17  ;;  %v281_v1 = vld [vmem:[%s1983_s30 + $0x1f0] sm:$0xff]  ;;  %v294_v5 = vld [vmem:[%s1983_s30 + $0x258] sm:$0xff]  ;;  %v393_v11 = vpack.c.bf16 %v285_v0, %v279_v61  ;;  %v615_v43 = vld [vmem:[#allocation5 + $0x5a0] sm:$0xff] }
  0xb3   : > { %1382 = vmatpush1.bf16.msra.mxu1 %v693_v31  ;;  %v610_v13 = vld [vmem:[#allocation5 + $0x578] sm:$0xff]  ;;  %v395_v14 = vpack.c.bf16 %v287_v2, %v281_v1  ;;  %v293_v25 = vld [vmem:[%s1983_s30 + $0x250] sm:$0xff]  ;;  %v311_v50 = vld [vmem:[%s1983_s30 + $0x2e0] sm:$0xff] }
  0xb4   : > { %1044 = vmatpush1.bf16.msra.mxu0 %v693_v31  ;;  %1367 = vmatprep.subr.bf16.mxu1 %v696_v36  ;;  %v388_v31 = vpack.c.bf16 %v274_v20, %v268_v19  ;;  %v714_v18 = vpack.c.bf16 %v610_v13, %v608_v12  ;;  %v607_v19 = vld [vmem:[#allocation5 + $0x560] sm:$0xff]  ;;  %v609_v20 = vld [vmem:[#allocation5 + $0x570] sm:$0xff]  ;;  %v614_v23 = vld [vmem:[#allocation5 + $0x598] sm:$0xff] }
  0xb5   : > { %1045 = vmatprep.subr.bf16.mxu0 %v696_v36  ;;  %v593_v36 = vld [vmem:[#allocation5 + $0x4f0] sm:$0xff]  ;;  %v310_v28 = vld [vmem:[%s1983_s30 + $0x2d8] sm:$0xff]  ;;  %v336_v13 = vld [vmem:[%s1983_s30 + $0x3a8] sm:$0xff] }
  0xb6   : > { %778 = vmatmul.mubr.bf16.gmra.mrb[4].mxu1 %v369_v42  ;;  %v275_v42 = vld [vmem:[%s1983_s30 + $0x1c0] sm:$0xff]  ;;  %v306_v29 = vld [vmem:[%s1983_s30 + $0x2b8] sm:$0xff]  ;;  %v617_v44 = vld [vmem:[#allocation5 + $0x5b0] sm:$0xff] }
  0xb7   : > { %931 = vmatmul.mubr.bf16.gmra.mrb[4].mxu0 %v371_v46  ;;  %1383 = vmatpush1.bf16.msra.mxu1 %v695_v47  ;;  %v705_v46 = vpack.c.bf16 %v593_v36, %v591_v35  ;;  %v389_v54 = vpack.c.bf16 %v275_v42, %v269_v41  ;;  %v616_v36 = vld [vmem:[#allocation5 + $0x5a8] sm:$0xff]  ;;  %v305_v49 = vld [vmem:[%s1983_s30 + $0x2b0] sm:$0xff]  ;;  %v626_v61 = vld [vmem:[#allocation5 + $0x5f8] sm:$0xff] }
  0xb8   : > { %1046 = vmatpush1.bf16.msra.mxu0 %v695_v47  ;;  %787 = vmatprep.mubr.bf16.mxu1 %v376_v48  ;;  %v288_v47 = vld [vmem:[%s1983_s30 + $0x228] sm:$0xff]  ;;  %v708_v48 = vpack.c.bf16 %v598_v39, %v596_v38  ;;  %v401_v38 = vpack.c.bf16 %v299_v26, %v293_v25  ;;  %v330_v12 = vld [vmem:[%s1983_s30 + $0x378] sm:$0xff] }
  0xb9   : > { %940 = vmatprep.mubr.bf16.mxu0 %v378_v51  ;;  %1047 = vmatprep.subr.bf16.mxu0 %v698_v52  ;;  %v387_v51 = vpack.c.bf16 %v273_v40, %v267_v37  ;;  %v396_v56 = vpack.c.bf16 %v288_v47, %v282_v45  ;;  %v618_v37 = vld [vmem:[#allocation5 + $0x5b8] sm:$0xff]  ;;  %v303_v45 = vld [vmem:[%s1983_s30 + $0x2a0] sm:$0xff]  ;;  %v348_v25 = vld [vmem:[%s1983_s30 + $0x408] sm:$0xff] }
  0xba   : > { %1368 = vmatprep.subr.bf16.mxu1 %v698_v52  ;;  %v600_v52 = vld [vmem:[#allocation5 + $0x528] sm:$0xff]  ;;  %v718_v42 = vpack.c.bf16 %v618_v37, %v616_v36  ;;  %v622_v47 = vld [vmem:[#allocation5 + $0x5d8] sm:$0xff] }
  0xbb   : > { %1384 = vmatpush1.bf16.msra.mxu1 %v697_v59  ;;  %v710_v58 = vpack.c.bf16 %v602_v53, %v600_v52  ;;  %v322_v52 = vld [vmem:[%s1983_s30 + $0x338] sm:$0xff]  ;;  %v360_v37 = vld [vmem:[%s1983_s30 + $0x468] sm:$0xff] }
  0xbc   : > { %1048 = vmatpush1.bf16.msra.mxu0 %v697_v59  ;;  %1369 = vmatprep.subr.bf16.mxu1 %v700_v63  ;;  %v599_v59 = vld [vmem:[#allocation5 + $0x520] sm:$0xff]  ;;  %v318_v53 = vld [vmem:[%s1983_s30 + $0x318] sm:$0xff] }
  0xbd   : > { %1049 = vmatprep.subr.bf16.mxu0 %v700_v63  ;;  %v606_v63 = vld [vmem:[#allocation5 + $0x558] sm:$0xff] }
  0xbe   : > { %788 = vmatmul.mubr.bf16.gmra.mrb[8].mxu1 %v375_v3  ;;  %v292_v3 = vld [vmem:[%s1983_s30 + $0x248] sm:$0xff]  ;;  %v354_v36 = vld [vmem:[%s1983_s30 + $0x438] sm:$0xff] }
  0xbf   : > { %941 = vmatmul.mubr.bf16.gmra.mrb[8].mxu0 %v377_v6  ;;  %797 = vmatprep.mubr.bf16.mxu1 %v382_v7  ;;  %v709_v6 = vpack.c.bf16 %v601_v60, %v599_v59  ;;  %v300_v7 = vld [vmem:[%s1983_s30 + $0x288] sm:$0xff]  ;;  %v400_v15 = vpack.c.bf16 %v298_v4, %v292_v3  ;;  %v623_v3 = vld [vmem:[#allocation5 + $0x5e0] sm:$0xff]  ;;  %v625_v4 = vld [vmem:[#allocation5 + $0x5f0] sm:$0xff] }
  0xc0   : > { %950 = vmatprep.mubr.bf16.mxu0 %v384_v8  ;;  %1050 = vmatpush1.bf16.msra.mxu0 %v699_v9  ;;  %v712_v8 = vpack.c.bf16 %v606_v63, %v604_v62  ;;  %v402_v16 = vpack.c.bf16 %v300_v7, %v294_v5  ;;  %v624_v60 = vld [vmem:[#allocation5 + $0x5e8] sm:$0xff]  ;;  %v407_v62 = vpack.c.bf16 %v311_v50, %v305_v49  ;;  %v315_v5 = vld [vmem:[%s1983_s30 + $0x300] sm:$0xff]  ;;  %v317_v7 = vld [vmem:[%s1983_s30 + $0x310] sm:$0xff] }
  0xc1   : > { %1385 = vmatpush1.bf16.msra.mxu1 %v699_v9  ;;  %1051 = vmatprep.subr.bf16.mxu0 %v702_v10  ;;  %v603_v9 = vld [vmem:[#allocation5 + $0x540] sm:$0xff]  ;;  %v722_v2 = vpack.c.bf16 %v626_v61, %v624_v60  ;;  %v230_v49 = vld [vmem:[%s1983_s30 + $0x58] sm:$0xff]  ;;  %v236_v60 = vld [vmem:[%s1983_s30 + $0x88] sm:$0xff] }
  0xc2   : > { %1370 = vmatprep.subr.bf16.mxu1 %v702_v10  ;;  %v605_v10 = vld [vmem:[#allocation5 + $0x550] sm:$0xff]  ;;  %v242_v61 = vld [vmem:[%s1983_s30 + $0xb8] sm:$0xff] }
  0xc3   : > { %v711_v17 = vpack.c.bf16 %v605_v10, %v603_v9  ;;  %v328_v9 = vld [vmem:[%s1983_s30 + $0x368] sm:$0xff]  ;;  %v334_v10 = vld [vmem:[%s1983_s30 + $0x398] sm:$0xff] }
  0xc4   : > { %1052 = vmatpush1.bf16.msra.mxu0 %v701_v22 }
  0xc5   : > { %1386 = vmatpush1.bf16.msra.mxu1 %v701_v22  ;;  %1053 = vmatprep.subr.bf16.mxu0 %v704_v24  ;;  %v612_v22 = vld [vmem:[#allocation5 + $0x588] sm:$0xff] }
  0xc6   : > { %798 = vmatmul.mubr.bf16.gmra.mrb[12].mxu1 %v381_v27  ;;  %1371 = vmatprep.subr.bf16.mxu1 %v704_v24  ;;  %v297_v24 = vld [vmem:[%s1983_s30 + $0x270] sm:$0xff]  ;;  %v304_v27 = vld [vmem:[%s1983_s30 + $0x2a8] sm:$0xff] }
  0xc7   : > { %951 = vmatmul.mubr.bf16.gmra.mrb[12].mxu0 %v383_v30  ;;  %807 = vmatprep.mubr.bf16.mxu1 %v388_v31  ;;  %v713_v30 = vpack.c.bf16 %v609_v20, %v607_v19  ;;  %v312_v31 = vld [vmem:[%s1983_s30 + $0x2e8] sm:$0xff]  ;;  %v399_v35 = vpack.c.bf16 %v297_v24, %v291_v21  ;;  %v406_v39 = vpack.c.bf16 %v310_v28, %v304_v27  ;;  %v333_v19 = vld [vmem:[%s1983_s30 + $0x390] sm:$0xff]  ;;  %v335_v21 = vld [vmem:[%s1983_s30 + $0x3a0] sm:$0xff] }
  0xc8   : > { %960 = vmatprep.mubr.bf16.mxu0 %v390_v32  ;;  %1054 = vmatpush1.bf16.msra.mxu0 %v703_v33  ;;  %v716_v32 = vpack.c.bf16 %v614_v23, %v612_v22  ;;  %v408_v40 = vpack.c.bf16 %v312_v31, %v306_v29  ;;  %v329_v20 = vld [vmem:[%s1983_s30 + $0x370] sm:$0xff]  ;;  %v340_v22 = vld [vmem:[%s1983_s30 + $0x3c8] sm:$0xff]  ;;  %v346_v23 = vld [vmem:[%s1983_s30 + $0x3f8] sm:$0xff] }
  0xc9   : > { %1387 = vmatpush1.bf16.msra.mxu1 %v703_v33  ;;  %1055 = vmatprep.subr.bf16.mxu0 %v706_v34  ;;  %v611_v33 = vld [vmem:[#allocation5 + $0x580] sm:$0xff]  ;;  %v342_v24 = vld [vmem:[%s1983_s30 + $0x3d8] sm:$0xff]  ;;  %v419_v27 = vpack.c.bf16 %v335_v21, %v329_v20  ;;  %v424_v28 = vpack.c.bf16 %v346_v23, %v340_v22  ;;  %v345_v31 = vld [vmem:[%s1983_s30 + $0x3f0] sm:$0xff] }
  0xca   : > { %1372 = vmatprep.subr.bf16.mxu1 %v706_v34  ;;  %v613_v34 = vld [vmem:[#allocation5 + $0x590] sm:$0xff]  ;;  %v426_v29 = vpack.c.bf16 %v348_v25, %v342_v24  ;;  %v260_v20 = vld [vmem:[%s1983_s30 + $0x148] sm:$0xff]  ;;  %v266_v21 = vld [vmem:[%s1983_s30 + $0x178] sm:$0xff] }
  0xcb   : > { %v715_v41 = vpack.c.bf16 %v613_v34, %v611_v33  ;;  %v347_v33 = vld [vmem:[%s1983_s30 + $0x400] sm:$0xff]  ;;  %v352_v34 = vld [vmem:[%s1983_s30 + $0x428] sm:$0xff]  ;;  %v386_v25 = vpack.c.bf16 %v266_v21, %v260_v20 }
  0xcc   : > { %1056 = vmatpush1.bf16.msra.mxu0 %v705_v46 }
  0xcd   : > { %1388 = vmatpush1.bf16.msra.mxu1 %v705_v46  ;;  %1057 = vmatprep.subr.bf16.mxu0 %v708_v48  ;;  %v620_v46 = vld [vmem:[#allocation5 + $0x5c8] sm:$0xff] }
  0xce   : > { %808 = vmatmul.mubr.bf16.gmra.mrb[16].mxu1 %v387_v51  ;;  %1373 = vmatprep.subr.bf16.mxu1 %v708_v48  ;;  %v309_v48 = vld [vmem:[%s1983_s30 + $0x2d0] sm:$0xff]  ;;  %v316_v51 = vld [vmem:[%s1983_s30 + $0x308] sm:$0xff] }
  0xcf   : > { %961 = vmatmul.mubr.bf16.gmra.mrb[16].mxu0 %v389_v54  ;;  %817 = vmatprep.mubr.bf16.mxu1 %v394_v55  ;;  %v717_v54 = vpack.c.bf16 %v617_v44, %v615_v43  ;;  %v324_v55 = vld [vmem:[%s1983_s30 + $0x348] sm:$0xff]  ;;  %v405_v59 = vpack.c.bf16 %v309_v48, %v303_v45  ;;  %v412_v63 = vpack.c.bf16 %v322_v52, %v316_v51  ;;  %v357_v43 = vld [vmem:[%s1983_s30 + $0x450] sm:$0xff]  ;;  %v359_v45 = vld [vmem:[%s1983_s30 + $0x460] sm:$0xff] }
  0xd0   : > { %970 = vmatprep.mubr.bf16.mxu0 %v396_v56  ;;  %1058 = vmatpush1.bf16.msra.mxu0 %v707_v57  ;;  %v720_v56 = vpack.c.bf16 %v622_v47, %v620_v46  ;;  %v414_v0 = vpack.c.bf16 %v324_v55, %v318_v53  ;;  %v353_v44 = vld [vmem:[%s1983_s30 + $0x430] sm:$0xff]  ;;  %v296_v46 = vld [vmem:[%s1983_s30 + $0x268] sm:$0xff]  ;;  %v302_v47 = vld [vmem:[%s1983_s30 + $0x298] sm:$0xff] }
  0xd1   : > { %1389 = vmatpush1.bf16.msra.mxu1 %v707_v57  ;;  %1059 = vmatprep.subr.bf16.mxu0 %v710_v58  ;;  %v619_v57 = vld [vmem:[#allocation5 + $0x5c0] sm:$0xff]  ;;  %v224_v48 = vld [vmem:[%s1983_s30 + $0x28] sm:$0xff]  ;;  %v431_v51 = vpack.c.bf16 %v359_v45, %v353_v44  ;;  %v404_v52 = vpack.c.bf16 %v302_v47, %v296_v46  ;;  %v290_v45 = vld [vmem:[%s1983_s30 + $0x238] sm:$0xff] }
  0xd2   : > { %1374 = vmatprep.subr.bf16.mxu1 %v710_v58  ;;  %v621_v58 = vld [vmem:[#allocation5 + $0x5d0] sm:$0xff]  ;;  %v368_v53 = vpack.c.bf16 %v230_v49, %v224_v48  ;;  %v295_v55 = vld [vmem:[%s1983_s30 + $0x260] sm:$0xff]  ;;  %v284_v44 = vld [vmem:[%s1983_s30 + $0x208] sm:$0xff] }
  0xd3   : > { %v719_v1 = vpack.c.bf16 %v621_v58, %v619_v57  ;;  %v229_v57 = vld [vmem:[%s1983_s30 + $0x50] sm:$0xff]  ;;  %v308_v58 = vld [vmem:[%s1983_s30 + $0x2c8] sm:$0xff]  ;;  %v398_v49 = vpack.c.bf16 %v290_v45, %v284_v44 }
  0xd4   : > { %1060 = vmatpush1.bf16.msra.mxu0 %v709_v6 }
  0xd5   : > { %1390 = vmatpush1.bf16.msra.mxu1 %v709_v6  ;;  %1061 = vmatprep.subr.bf16.mxu0 %v712_v8  ;;  %v321_v6 = vld [vmem:[%s1983_s30 + $0x330] sm:$0xff] }
  0xd6   : > { %818 = vmatmul.mubr.bf16.gmra.mrb[20].mxu1 %v393_v11  ;;  %1375 = vmatprep.subr.bf16.mxu1 %v712_v8  ;;  %v323_v8 = vld [vmem:[%s1983_s30 + $0x340] sm:$0xff]  ;;  %v721_v11 = vpack.c.bf16 %v625_v4, %v623_v3  ;;  %v313_v4 = vld [vmem:[%s1983_s30 + $0x2f0] sm:$0xff] }
  0xd7   : > { %971 = vmatmul.mubr.bf16.gmra.mrb[20].mxu0 %v395_v14  ;;  %827 = vmatprep.mubr.bf16.mxu1 %v400_v15  ;;  %v411_v14 = vpack.c.bf16 %v321_v6, %v315_v5  ;;  %v413_v15 = vpack.c.bf16 %v323_v8, %v317_v7  ;;  %v307_v3 = vld [vmem:[%s1983_s30 + $0x2c0] sm:$0xff]  ;;  %v241_v5 = vld [vmem:[%s1983_s30 + $0xb0] sm:$0xff]  ;;  %v320_v6 = vld [vmem:[%s1983_s30 + $0x328] sm:$0xff] }
  0xd8   : > { %980 = vmatprep.mubr.bf16.mxu0 %v402_v16  ;;  %1062 = vmatpush1.bf16.msra.mxu0 %v711_v17  ;;  %v418_v16 = vpack.c.bf16 %v334_v10, %v328_v9  ;;  %v326_v7 = vld [vmem:[%s1983_s30 + $0x358] sm:$0xff]  ;;  %v248_v8 = vld [vmem:[%s1983_s30 + $0xe8] sm:$0xff]  ;;  %v409_v10 = vpack.c.bf16 %v313_v4, %v307_v3 }
  0xd9   : > { %1391 = vmatpush1.bf16.msra.mxu1 %v711_v17  ;;  %1063 = vmatprep.subr.bf16.mxu0 %v714_v18  ;;  %v420_v17 = vpack.c.bf16 %v336_v13, %v330_v12  ;;  %v254_v9 = vld [vmem:[%s1983_s30 + $0x118] sm:$0xff]  ;;  %v416_v12 = vpack.c.bf16 %v326_v7, %v320_v6 }
  0xda   : > { %1376 = vmatprep.subr.bf16.mxu1 %v714_v18  ;;  %v327_v18 = vld [vmem:[%s1983_s30 + $0x360] sm:$0xff]  ;;  %v380_v13 = vpack.c.bf16 %v254_v9, %v248_v8 }
  0xdb   : > { %v417_v26 = vpack.c.bf16 %v333_v19, %v327_v18  ;;  %v332_v18 = vld [vmem:[%s1983_s30 + $0x388] sm:$0xff]  ;;  %v338_v19 = vld [vmem:[%s1983_s30 + $0x3b8] sm:$0xff] }
  0xdc   : > { %1064 = vmatpush1.bf16.msra.mxu0 %v713_v30  ;;  %v422_v24 = vpack.c.bf16 %v338_v19, %v332_v18  ;;  %v723_v19 = vld [vmem:[#allocation7] sm:$0x3] }
  0xdd   : > { %1392 = vmatpush1.bf16.msra.mxu1 %v713_v30  ;;  %1065 = vmatprep.subr.bf16.mxu0 %v716_v32  ;;  %v339_v30 = vld [vmem:[%s1983_s30 + $0x3c0] sm:$0xff] }
  0xde   : > { %828 = vmatmul.mubr.bf16.gmra.mrb[24].mxu1 %v399_v35  ;;  %1377 = vmatprep.subr.bf16.mxu1 %v716_v32  ;;  %v341_v32 = vld [vmem:[%s1983_s30 + $0x3d0] sm:$0xff]  ;;  %v358_v35 = vld [vmem:[%s1983_s30 + $0x458] sm:$0xff] }
  0xdf   : > { %981 = vmatmul.mubr.bf16.gmra.mrb[24].mxu0 %v401_v38  ;;  %837 = vmatprep.mubr.bf16.mxu1 %v406_v39  ;;  %v423_v38 = vpack.c.bf16 %v345_v31, %v339_v30  ;;  %v425_v39 = vpack.c.bf16 %v347_v33, %v341_v32  ;;  %v344_v30 = vld [vmem:[%s1983_s30 + $0x3e8] sm:$0xff]  ;;  %v350_v31 = vld [vmem:[%s1983_s30 + $0x418] sm:$0xff] }
  0xe0   : > { %990 = vmatprep.mubr.bf16.mxu0 %v408_v40  ;;  %1066 = vmatpush1.bf16.msra.mxu0 %v715_v41  ;;  %v430_v40 = vpack.c.bf16 %v358_v35, %v352_v34  ;;  %v272_v32 = vld [vmem:[%s1983_s30 + $0x1a8] sm:$0xff]  ;;  %v278_v33 = vld [vmem:[%s1983_s30 + $0x1d8] sm:$0xff] }
  0xe1   : > { %1393 = vmatpush1.bf16.msra.mxu1 %v715_v41  ;;  %1067 = vmatprep.subr.bf16.mxu0 %v718_v42  ;;  %v432_v41 = vpack.c.bf16 %v360_v37, %v354_v36  ;;  %v428_v36 = vpack.c.bf16 %v350_v31, %v344_v30  ;;  %v392_v37 = vpack.c.bf16 %v278_v33, %v272_v32 }
  0xe2   : > { %1378 = vmatprep.subr.bf16.mxu1 %v718_v42  ;;  %v351_v42 = vld [vmem:[%s1983_s30 + $0x420] sm:$0xff] }
  0xe3   : > { %v429_v50 = vpack.c.bf16 %v357_v43, %v351_v42  ;;  %v356_v42 = vld [vmem:[%s1983_s30 + $0x448] sm:$0xff]  ;;  %v362_v43 = vld [vmem:[%s1983_s30 + $0x478] sm:$0xff] }
  0xe4   : > { %1068 = vmatpush1.bf16.msra.mxu0 %v717_v54  ;;  %v434_v48 = vpack.c.bf16 %v362_v43, %v356_v42 }
  0xe5   : > { %1394 = vmatpush1.bf16.msra.mxu1 %v717_v54  ;;  %1069 = vmatprep.subr.bf16.mxu0 %v720_v56  ;;  %v223_v54 = vld [vmem:[%s1983_s30 + $0x20] sm:$0xff] }
  0xe6   : > { %838 = vmatmul.mubr.bf16.gmra.mrb[28].mxu1 %v405_v59  ;;  %1379 = vmatprep.subr.bf16.mxu1 %v720_v56  ;;  %v301_v56 = vld [vmem:[%s1983_s30 + $0x290] sm:$0xff]  ;;  %v314_v59 = vld [vmem:[%s1983_s30 + $0x2f8] sm:$0xff] }
  0xe7   : > { %991 = vmatmul.mubr.bf16.gmra.mrb[28].mxu0 %v407_v62  ;;  %847 = vmatprep.mubr.bf16.mxu1 %v412_v63  ;;  %v403_v62 = vpack.c.bf16 %v301_v56, %v295_v55  ;;  %v367_v63 = vpack.c.bf16 %v229_v57, %v223_v54 }
  0xe8   : > { %1000 = vmatprep.mubr.bf16.mxu0 %v414_v0  ;;  %1070 = vmatpush1.bf16.msra.mxu0 %v719_v1  ;;  %v410_v0 = vpack.c.bf16 %v314_v59, %v308_v58 }
  0xe9   : > { %1395 = vmatpush1.bf16.msra.mxu1 %v719_v1  ;;  %1071 = vmatprep.subr.bf16.mxu0 %v722_v2  ;;  %v374_v1 = vpack.c.bf16 %v242_v61, %v236_v60 }
  0xea   : > { %1380 = vmatprep.subr.bf16.mxu1 %v722_v2  ;;  %v235_v2 = vld [vmem:[%s1983_s30 + $0x80] sm:$0xff] }
  0xec   : > { %1072 = vmatpush1.bf16.msra.mxu0 %v721_v11 }
  0xed   : > { %1396 = vmatpush1.bf16.msra.mxu1 %v721_v11  ;;  %v373_v11 = vpack.c.bf16 %v241_v5, %v235_v2 }
  0xee   : > { %848 = vmatmul.mubr.bf16.gmra.mrb[32].mxu1 %v411_v14  ;;  %v247_v14 = vld [vmem:[%s1983_s30 + $0xe0] sm:$0xff] }
  0xef   : > { %1001 = vmatmul.mubr.bf16.gmra.mrb[32].mxu0 %v413_v15  ;;  %857 = vmatprep.mubr.bf16.mxu1 %v418_v16  ;;  %v319_v15 = vld [vmem:[%s1983_s30 + $0x320] sm:$0xff]  ;;  %v325_v16 = vld [vmem:[%s1983_s30 + $0x350] sm:$0xff] }
  0xf0   : > { %1010 = vmatprep.mubr.bf16.mxu0 %v420_v17  ;;  %v253_v17 = vld [vmem:[%s1983_s30 + $0x110] sm:$0xff]  ;;  %v415_v22 = vpack.c.bf16 %v325_v16, %v319_v15 }
  0xf1   : > { %v379_v23 = vpack.c.bf16 %v253_v17, %v247_v14 }
  0xf6   : > { %858 = vmatmul.mubr.bf16.gmra.mrb[36].mxu1 %v417_v26  ;;  %v259_v26 = vld [vmem:[%s1983_s30 + $0x140] sm:$0xff] }
  0xf7   : > { %1011 = vmatmul.mubr.bf16.gmra.mrb[36].mxu0 %v419_v27  ;;  %867 = vmatprep.mubr.bf16.mxu1 %v424_v28  ;;  %v331_v27 = vld [vmem:[%s1983_s30 + $0x380] sm:$0xff]  ;;  %v337_v28 = vld [vmem:[%s1983_s30 + $0x3b0] sm:$0xff] }
  0xf8   : > { %1020 = vmatprep.mubr.bf16.mxu0 %v426_v29  ;;  %v265_v29 = vld [vmem:[%s1983_s30 + $0x170] sm:$0xff]  ;;  %v421_v34 = vpack.c.bf16 %v337_v28, %v331_v27 }
  0xf9   : > { %v385_v35 = vpack.c.bf16 %v265_v29, %v259_v26 }
  0xfe   : > { %868 = vmatmul.mubr.bf16.gmra.mrb[40].mxu1 %v423_v38  ;;  %v271_v38 = vld [vmem:[%s1983_s30 + $0x1a0] sm:$0xff] }
  0xff   : > { %1021 = vmatmul.mubr.bf16.gmra.mrb[40].mxu0 %v425_v39  ;;  %877 = vmatprep.mubr.bf16.mxu1 %v430_v40  ;;  %v343_v39 = vld [vmem:[%s1983_s30 + $0x3e0] sm:$0xff]  ;;  %v349_v40 = vld [vmem:[%s1983_s30 + $0x410] sm:$0xff] }
 0x100   : > { %1030 = vmatprep.mubr.bf16.mxu0 %v432_v41  ;;  %v277_v41 = vld [vmem:[%s1983_s30 + $0x1d0] sm:$0xff]  ;;  %v427_v46 = vpack.c.bf16 %v349_v40, %v343_v39 }
 0x101   : > { %v391_v47 = vpack.c.bf16 %v277_v41, %v271_v38 }
 0x106   : > { %878 = vmatmul.mubr.bf16.gmra.mrb[44].mxu1 %v429_v50  ;;  %v355_v50 = vld [vmem:[%s1983_s30 + $0x440] sm:$0xff] }
 0x107   : > { %1031 = vmatmul.mubr.bf16.gmra.mrb[44].mxu0 %v431_v51  ;;  %1133 = vmatprep.mubr.bf16.mxu1 %v404_v52  ;;  %v361_v51 = vld [vmem:[%s1983_s30 + $0x470] sm:$0xff]  ;;  %v283_v52 = vld [vmem:[%s1983_s30 + $0x200] sm:$0xff] }
 0x108   : > { %1073 = vmatprep.mubr.bf16.mxu0 %v368_v53  ;;  %v289_v53 = vld [vmem:[%s1983_s30 + $0x230] sm:$0xff]  ;;  %v433_v54 = vpack.c.bf16 %v361_v51, %v355_v50 }
 0x109   : > { %v397_v55 = vpack.c.bf16 %v289_v53, %v283_v52 }
 0x10e   : > { %1134 = vmatmul.mubr.bf16.vlgmr.msra.gmra.mrb[48].mxu1 %v403_v62 }
 0x10f   : > { %1074 = vmatmul.mubr.bf16.vlgmr.msra.gmra.mrb[0].mxu0 %v367_v63  ;;  %1143 = vmatprep.mubr.bf16.mxu1 %v410_v0 }
 0x110   : > { %1083 = vmatprep.mubr.bf16.mxu0 %v374_v1 }
 0x116   : > { %1144 = vmatmul.mubr.bf16.gmra.mrb[52].mxu1 %v409_v10 }
 0x117   : > { %1084 = vmatmul.mubr.bf16.gmra.mrb[4].mxu0 %v373_v11  ;;  %1153 = vmatprep.mubr.bf16.mxu1 %v416_v12  ;;  %v725_v11 = vlaneseq }
 0x118   : > { %1093 = vmatprep.mubr.bf16.mxu0 %v380_v13 }
 0x119   : > { %v726_v13 = vshrl.u32 %v725_v11, 7 }
 0x11b   : > { %v727_v17 = vsub.s32 0, %v726_v13  ;;  %v731_v20 = vsub.s32 1, %v726_v13 }
 0x11d   : > { %v2185_v21 = vrot.slane %v723_v19, %v727_v17 }
 0x11e   : > { %1154 = vmatmul.mubr.bf16.gmra.mrb[56].mxu1 %v415_v22  ;;  %v2187_v22 = vrot.slane %v723_v19, %v731_v20 }
 0x11f   : > { %1094 = vmatmul.mubr.bf16.gmra.mrb[8].mxu0 %v379_v23  ;;  %1163 = vmatprep.mubr.bf16.mxu1 %v422_v24 }
 0x120   : > { %1103 = vmatprep.mubr.bf16.mxu0 %v386_v25 }
 0x126   : > { %1164 = vmatmul.mubr.bf16.gmra.mrb[60].mxu1 %v421_v34 }
 0x127   : > { %1104 = vmatmul.mubr.bf16.gmra.mrb[12].mxu0 %v385_v35  ;;  %1173 = vmatprep.mubr.bf16.mxu1 %v428_v36 }
 0x128   : > { %1113 = vmatprep.mubr.bf16.mxu0 %v392_v37 }
 0x12e   : > { %1174 = vmatmul.mubr.bf16.gmra.mrb[64].mxu1 %v427_v46 }
 0x12f   : > { %1114 = vmatmul.mubr.bf16.gmra.mrb[16].mxu0 %v391_v47  ;;  %1183 = vmatprep.mubr.bf16.mxu1 %v434_v48 }
 0x130   : > { %1123 = vmatprep.mubr.bf16.mxu0 %v398_v49 }
 0x136   : > { %1184 = vmatmul.mubr.bf16.gmra.mrb[68].mxu1 %v433_v54 }
 0x137   : > { %1124 = vmatmul.mubr.bf16.gmra.mrb[20].mxu0 %v397_v55 }
 0x181   : > { %v2137_v56 = vpop.f32.mrb[0].mxu1 }
 0x182   : > { %v2139_v57 = vpop.f32.mrb[1].mxu1 }
 0x183   : > { %v2141_v58 = vpop.f32.mrb[2].mxu1 }
 0x184   : > { %v2143_v59 = vpop.f32.mrb[3].mxu1 }
 0x189   : > { %v2145_v60 = vpop.f32.mrb[4].mxu1 }
 0x18a   : > { %v2147_v61 = vpop.f32.mrb[5].mxu1 }
 0x18b   : > { %v2149_v62 = vpop.f32.mrb[6].mxu1 }
 0x18c   : > { %v2151_v63 = vpop.f32.mrb[7].mxu1 }
 0x191   : > { %v2153_v0 = vpop.f32.mrb[8].mxu1 }
 0x192   : > { %v2155_v1 = vpop.f32.mrb[9].mxu1 }
 0x193   : > { %v2157_v2 = vpop.f32.mrb[10].mxu1 }
 0x194   : > { %v2159_v3 = vpop.f32.mrb[11].mxu1 }
 0x199   : > { %v2161_v4 = vpop.f32.mrb[12].mxu1 }
 0x19a   : > { %v2163_v5 = vpop.f32.mrb[13].mxu1 }
 0x19b   : > { %v2165_v6 = vpop.f32.mrb[14].mxu1 }
 0x19c   : > { %v2167_v7 = vpop.f32.mrb[15].mxu1 }
 0x1a1   : > { %v2169_v8 = vpop.f32.mrb[16].mxu1 }
 0x1a2   : > { %v2171_v9 = vpop.f32.mrb[17].mxu1 }
 0x1a3   : > { %v2173_v10 = vpop.f32.mrb[18].mxu1 }
 0x1a4   : > { %v2175_v12 = vpop.f32.mrb[19].mxu1 }
 0x1a9   : > { %v2177_v14 = vpop.f32.mrb[20].mxu1 }
 0x1aa   : > { %v2179_v15 = vpop.f32.mrb[21].mxu1 }
 0x1ab   : > { %v2181_v16 = vpop.f32.mrb[22].mxu1 }
 0x1ac   : > { %v2183_v18 = vpop.f32.mrb[23].mxu1 }
 0x1b1   : > { %v829_v23 = vpop.f32.mrb[24].mxu1 }
 0x1b2   : > { %v830_v24 = vadd.f32 %v829_v23, %v2185_v21  ;;  %v982_v25 = vpop.f32.mrb[24].mxu0  ;;  %v831_v26 = vpop.f32.mrb[25].mxu1 }
 0x1b3   : > { %v832_v27 = vadd.f32 %v831_v26, %v2187_v22  ;;  %v984_v28 = vpop.f32.mrb[25].mxu0  ;;  %v833_v29 = vpop.f32.mrb[26].mxu1 }
 0x1b4   : > { %v2191_v30 = vadd.f32 %v982_v25, %v830_v24  ;;  %v834_v31 = vadd.f32 %v833_v29, %v2185_v21  ;;  %v986_v32 = vpop.f32.mrb[26].mxu0  ;;  %v835_v33 = vpop.f32.mrb[27].mxu1 }
 0x1b5   : > { %v2194_v34 = vadd.f32 %v984_v28, %v832_v27  ;;  %v836_v35 = vadd.f32 %v835_v33, %v2187_v22  ;;  %v988_v36 = vpop.f32.mrb[27].mxu0 }
 0x1b6   : > { %v2197_v37 = vadd.f32 %v986_v32, %v834_v31 }
 0x1b7   : > { %v2199_v38 = vadd.f32 %v988_v36, %v836_v35 }
 0x1b9   : > { %v839_v39 = vpop.f32.mrb[28].mxu1 }
 0x1ba   : > { %v840_v40 = vadd.f32 %v839_v39, %v2185_v21  ;;  %v992_v41 = vpop.f32.mrb[28].mxu0  ;;  %v841_v42 = vpop.f32.mrb[29].mxu1 }
 0x1bb   : > { %v842_v43 = vadd.f32 %v841_v42, %v2187_v22  ;;  %v994_v44 = vpop.f32.mrb[29].mxu0  ;;  %v843_v45 = vpop.f32.mrb[30].mxu1 }
 0x1bc   : > { %v2203_v46 = vadd.f32 %v992_v41, %v840_v40  ;;  %v844_v47 = vadd.f32 %v843_v45, %v2185_v21  ;;  %v996_v48 = vpop.f32.mrb[30].mxu0  ;;  %v845_v49 = vpop.f32.mrb[31].mxu1 }
 0x1bd   : > { %v2206_v50 = vadd.f32 %v994_v44, %v842_v43  ;;  %v846_v51 = vadd.f32 %v845_v49, %v2187_v22  ;;  %v998_v52 = vpop.f32.mrb[31].mxu0 }
 0x1be   : > { %v2209_v53 = vadd.f32 %v996_v48, %v844_v47 }
 0x1bf   : > { %v2211_v54 = vadd.f32 %v998_v52, %v846_v51 }
 0x1c1   : > { %v849_v55 = vpop.f32.mrb[32].mxu1 }
 0x1c2   : > { %v850_v11 = vadd.f32 %v849_v55, %v2185_v21  ;;  %v1002_v13 = vpop.f32.mrb[32].mxu0  ;;  %v851_v17 = vpop.f32.mrb[33].mxu1 }
 0x1c3   : > { %v852_v19 = vadd.f32 %v851_v17, %v2187_v22  ;;  %v1004_v20 = vpop.f32.mrb[33].mxu0  ;;  %v853_v23 = vpop.f32.mrb[34].mxu1 }
 0x1c4   : > { %v2215_v24 = vadd.f32 %v1002_v13, %v850_v11  ;;  %v854_v25 = vadd.f32 %v853_v23, %v2185_v21  ;;  %v1006_v26 = vpop.f32.mrb[34].mxu0  ;;  %v855_v27 = vpop.f32.mrb[35].mxu1 }
 0x1c5   : > { %v2218_v28 = vadd.f32 %v1004_v20, %v852_v19  ;;  %v856_v29 = vadd.f32 %v855_v27, %v2187_v22  ;;  %v1008_v31 = vpop.f32.mrb[35].mxu0 }
 0x1c6   : > { %v2221_v32 = vadd.f32 %v1006_v26, %v854_v25 }
 0x1c7   : > { %v2223_v33 = vadd.f32 %v1008_v31, %v856_v29 }
 0x1c9   : > { %v859_v35 = vpop.f32.mrb[36].mxu1 }
 0x1ca   : > { %v860_v36 = vadd.f32 %v859_v35, %v2185_v21  ;;  %v1012_v39 = vpop.f32.mrb[36].mxu0  ;;  %v861_v40 = vpop.f32.mrb[37].mxu1 }
 0x1cb   : > { %v862_v41 = vadd.f32 %v861_v40, %v2187_v22  ;;  %v1014_v42 = vpop.f32.mrb[37].mxu0  ;;  %v863_v43 = vpop.f32.mrb[38].mxu1 }
 0x1cc   : > { %v2227_v44 = vadd.f32 %v1012_v39, %v860_v36  ;;  %v864_v45 = vadd.f32 %v863_v43, %v2185_v21  ;;  %v1016_v47 = vpop.f32.mrb[38].mxu0  ;;  %v865_v48 = vpop.f32.mrb[39].mxu1 }
 0x1cd   : > { %v2230_v49 = vadd.f32 %v1014_v42, %v862_v41  ;;  %v866_v51 = vadd.f32 %v865_v48, %v2187_v22  ;;  %v1018_v52 = vpop.f32.mrb[39].mxu0 }
 0x1ce   : > { %v2233_v55 = vadd.f32 %v1016_v47, %v864_v45 }
 0x1cf   : > { %v2235_v11 = vadd.f32 %v1018_v52, %v866_v51 }
 0x1d1   : > { %v869_v13 = vpop.f32.mrb[40].mxu1 }
 0x1d2   : > { %v870_v17 = vadd.f32 %v869_v13, %v2185_v21  ;;  %v1022_v19 = vpop.f32.mrb[40].mxu0  ;;  %v871_v20 = vpop.f32.mrb[41].mxu1 }
 0x1d3   : > { %v872_v23 = vadd.f32 %v871_v20, %v2187_v22  ;;  %v1024_v25 = vpop.f32.mrb[41].mxu0  ;;  %v873_v26 = vpop.f32.mrb[42].mxu1 }
 0x1d4   : > { %v2239_v27 = vadd.f32 %v1022_v19, %v870_v17  ;;  %v874_v29 = vadd.f32 %v873_v26, %v2185_v21  ;;  %v1026_v31 = vpop.f32.mrb[42].mxu0  ;;  %v875_v35 = vpop.f32.mrb[43].mxu1 }
 0x1d5   : > { %v2242_v36 = vadd.f32 %v1024_v25, %v872_v23  ;;  %v876_v39 = vadd.f32 %v875_v35, %v2187_v22  ;;  %v1028_v40 = vpop.f32.mrb[43].mxu0 }
 0x1d6   : > { %v2245_v41 = vadd.f32 %v1026_v31, %v874_v29 }
 0x1d7   : > { %v2247_v42 = vadd.f32 %v1028_v40, %v876_v39  ;;  %v770_v39 = vadd.f32 %v2137_v56, %v2185_v21 }
 0x1d9   : > { %v879_v43 = vpop.f32.mrb[44].mxu1 }
 0x1da   : > { %v880_v45 = vadd.f32 %v879_v43, %v2185_v21  ;;  %v1032_v47 = vpop.f32.mrb[44].mxu0  ;;  %v881_v48 = vpop.f32.mrb[45].mxu1  ;;  %v772_v43 = vadd.f32 %v2139_v57, %v2187_v22 }
 0x1db   : > { %v882_v51 = vadd.f32 %v881_v48, %v2187_v22  ;;  %v1034_v52 = vpop.f32.mrb[45].mxu0  ;;  %v883_v13 = vpop.f32.mrb[46].mxu1 }
 0x1dc   : > { %v2251_v17 = vadd.f32 %v1032_v47, %v880_v45  ;;  %v884_v19 = vadd.f32 %v883_v13, %v2185_v21  ;;  %v1036_v20 = vpop.f32.mrb[46].mxu0  ;;  %v885_v23 = vpop.f32.mrb[47].mxu1 }
 0x1dd   : > { %v2254_v25 = vadd.f32 %v1034_v52, %v882_v51  ;;  %v886_v26 = vadd.f32 %v885_v23, %v2187_v22  ;;  %v1038_v29 = vpop.f32.mrb[47].mxu0  ;;  %v774_v51 = vadd.f32 %v2141_v58, %v2185_v21  ;;  %v776_v23 = vadd.f32 %v2143_v59, %v2187_v22 }
 0x1de   : > { %v2258_v31 = vadd.f32 %v1036_v20, %v884_v19 }
 0x1df   : > { %v2260_v35 = vadd.f32 %v1038_v29, %v886_v26 }
 0x1e1   : > { %v1135_v40 = vpop.f32.mrb[48].mxu1 }
 0x1e2   : > { %v1075_v45 = vpop.f32.mrb[0].mxu0  ;;  %v1136_v47 = vadd.f32 %v1135_v40, %v2191_v30  ;;  %v1137_v48 = vpop.f32.mrb[49].mxu1 }
 0x1e3   : > { %v1398_v52 = vadd.f32 %v1075_v45, %v770_v39  ;;  %v1077_v13 = vpop.f32.mrb[1].mxu0  ;;  %v1138_v19 = vadd.f32 %v1137_v48, %v2194_v34  ;;  %v1139_v20 = vpop.f32.mrb[50].mxu1  ;;  %v780_v39 = vadd.f32 %v2145_v60, %v2185_v21 }
 0x1e4   : > { %1218 = vst [vmem:[%s2272_s20 + $0xc0] sm:$0xff] %v1136_v47  ;;  %v1400_v56 = vadd.f32 %v1077_v13, %v772_v43  ;;  %v1079_v57 = vpop.f32.mrb[2].mxu0  ;;  %v1140_v58 = vadd.f32 %v1139_v20, %v2197_v37  ;;  %v1141_v30 = vpop.f32.mrb[51].mxu1  ;;  %v782_v37 = vadd.f32 %v2147_v61, %v2187_v22  ;;  %v784_v47 = vadd.f32 %v2149_v62, %v2185_v21 }
 0x1e5   : > { %1194 = vst [vmem:[%s2272_s20] sm:$0xff] %v1398_v52  ;;  %1219 = vst [vmem:[%s2272_s20 + $0xc8] sm:$0xff] %v1138_v19  ;;  %v1402_v34 = vadd.f32 %v1079_v57, %v774_v51  ;;  %v1081_v59 = vpop.f32.mrb[3].mxu0  ;;  %v1142_v26 = vadd.f32 %v1141_v30, %v2199_v38  ;;  %v786_v61 = vadd.f32 %v2151_v63, %v2187_v22 }
 0x1e6   : > { %1195 = vst [vmem:[%s2272_s20 + $0x8] sm:$0xff] %v1400_v56  ;;  %1220 = vst [vmem:[%s2272_s20 + $0xd0] sm:$0xff] %v1140_v58  ;;  %v1404_v29 = vadd.f32 %v1081_v59, %v776_v23  ;;  %v790_v63 = vadd.f32 %v2153_v0, %v2185_v21 }
 0x1e7   : > { %1196 = vst [vmem:[%s2272_s20 + $0x10] sm:$0xff] %v1402_v34  ;;  %1221 = vst [vmem:[%s2272_s20 + $0xd8] sm:$0xff] %v1142_v26  ;;  %v794_v34 = vadd.f32 %v2157_v2, %v2185_v21 }
 0x1e8   : > { %1197 = vst [vmem:[%s2272_s20 + $0x18] sm:$0xff] %v1404_v29 }
 0x1e9   : > { %v1145_v40 = vpop.f32.mrb[52].mxu1 }
 0x1ea   : > { %v1085_v43 = vpop.f32.mrb[4].mxu0  ;;  %v1146_v45 = vadd.f32 %v1145_v40, %v2203_v46  ;;  %v1147_v38 = vpop.f32.mrb[53].mxu1 }
 0x1eb   : > { %v1406_v48 = vadd.f32 %v1085_v43, %v780_v39  ;;  %v1087_v51 = vpop.f32.mrb[5].mxu0  ;;  %v1148_v52 = vadd.f32 %v1147_v38, %v2206_v50  ;;  %v1149_v60 = vpop.f32.mrb[54].mxu1 }
 0x1ec   : > { %1222 = vst [vmem:[%s2272_s20 + $0xe0] sm:$0xff] %v1146_v45  ;;  %v1408_v13 = vadd.f32 %v1087_v51, %v782_v37  ;;  %v1089_v46 = vpop.f32.mrb[6].mxu0  ;;  %v1150_v19 = vadd.f32 %v1149_v60, %v2209_v53  ;;  %v1151_v20 = vpop.f32.mrb[55].mxu1  ;;  %v792_v53 = vadd.f32 %v2155_v1, %v2187_v22  ;;  %v796_v1 = vadd.f32 %v2159_v3, %v2187_v22 }
 0x1ed   : > { %1198 = vst [vmem:[%s2272_s20 + $0x20] sm:$0xff] %v1406_v48  ;;  %1223 = vst [vmem:[%s2272_s20 + $0xe8] sm:$0xff] %v1148_v52  ;;  %v1410_v62 = vadd.f32 %v1089_v46, %v784_v47  ;;  %v1091_v23 = vpop.f32.mrb[7].mxu0  ;;  %v1152_v56 = vadd.f32 %v1151_v20, %v2211_v54  ;;  %v800_v3 = vadd.f32 %v2161_v4, %v2185_v21 }
 0x1ee   : > { %1199 = vst [vmem:[%s2272_s20 + $0x28] sm:$0xff] %v1408_v13  ;;  %1224 = vst [vmem:[%s2272_s20 + $0xf0] sm:$0xff] %v1150_v19  ;;  %v1412_v50 = vadd.f32 %v1091_v23, %v786_v61  ;;  %v804_v51 = vadd.f32 %v2165_v6, %v2185_v21 }
 0x1ef   : > { %1200 = vst [vmem:[%s2272_s20 + $0x30] sm:$0xff] %v1410_v62  ;;  %1225 = vst [vmem:[%s2272_s20 + $0xf8] sm:$0xff] %v1152_v56 }
 0x1f0   : > { %1201 = vst [vmem:[%s2272_s20 + $0x38] sm:$0xff] %v1412_v50 }
 0x1f1   : > { %v1155_v57 = vpop.f32.mrb[56].mxu1 }
 0x1f2   : > { %v1095_v58 = vpop.f32.mrb[8].mxu0  ;;  %v1156_v30 = vadd.f32 %v1155_v57, %v2215_v24  ;;  %v1157_v54 = vpop.f32.mrb[57].mxu1 }
 0x1f3   : > { %v1414_v59 = vadd.f32 %v1095_v58, %v790_v63  ;;  %v1097_v26 = vpop.f32.mrb[9].mxu0  ;;  %v1158_v29 = vadd.f32 %v1157_v54, %v2218_v28  ;;  %v1159_v0 = vpop.f32.mrb[58].mxu1  ;;  %v814_v63 = vadd.f32 %v2173_v10, %v2185_v21 }
 0x1f4   : > { %1226 = vst [vmem:[%s2272_s20 + $0x100] sm:$0xff] %v1156_v30  ;;  %v1416_v39 = vadd.f32 %v1097_v26, %v792_v53  ;;  %v1099_v24 = vpop.f32.mrb[10].mxu0  ;;  %v1160_v40 = vadd.f32 %v1159_v0, %v2221_v32  ;;  %v1161_v37 = vpop.f32.mrb[59].mxu1  ;;  %v802_v32 = vadd.f32 %v2163_v5, %v2187_v22  ;;  %v806_v5 = vadd.f32 %v2167_v7, %v2187_v22 }
 0x1f5   : > { %1202 = vst [vmem:[%s2272_s20 + $0x40] sm:$0xff] %v1414_v59  ;;  %1227 = vst [vmem:[%s2272_s20 + $0x108] sm:$0xff] %v1158_v29  ;;  %v1418_v2 = vadd.f32 %v1099_v24, %v794_v34  ;;  %v1101_v43 = vpop.f32.mrb[11].mxu0  ;;  %v1162_v45 = vadd.f32 %v1161_v37, %v2223_v33  ;;  %v810_v7 = vadd.f32 %v2169_v8, %v2185_v21 }
 0x1f6   : > { %1203 = vst [vmem:[%s2272_s20 + $0x48] sm:$0xff] %v1416_v39  ;;  %1228 = vst [vmem:[%s2272_s20 + $0x110] sm:$0xff] %v1160_v40  ;;  %v1420_v28 = vadd.f32 %v1101_v43, %v796_v1  ;;  %v824_v39 = vadd.f32 %v2181_v16, %v2185_v21 }
 0x1f7   : > { %1204 = vst [vmem:[%s2272_s20 + $0x50] sm:$0xff] %v1418_v2  ;;  %1229 = vst [vmem:[%s2272_s20 + $0x118] sm:$0xff] %v1162_v45 }
 0x1f8   : > { %1205 = vst [vmem:[%s2272_s20 + $0x58] sm:$0xff] %v1420_v28 }
 0x1f9   : > { %v1165_v38 = vpop.f32.mrb[60].mxu1 }
 0x1fa   : > { %v1105_v47 = vpop.f32.mrb[12].mxu0  ;;  %v1166_v48 = vadd.f32 %v1165_v38, %v2227_v44  ;;  %v1167_v33 = vpop.f32.mrb[61].mxu1 }
 0x1fb   : > { %v1422_v52 = vadd.f32 %v1105_v47, %v800_v3  ;;  %v1107_v60 = vpop.f32.mrb[13].mxu0  ;;  %v1168_v61 = vadd.f32 %v1167_v33, %v2230_v49  ;;  %v1169_v4 = vpop.f32.mrb[62].mxu1 }
 0x1fc   : > { %1230 = vst [vmem:[%s2272_s20 + $0x120] sm:$0xff] %v1166_v48  ;;  %v1424_v13 = vadd.f32 %v1107_v60, %v802_v32  ;;  %v1109_v44 = vpop.f32.mrb[14].mxu0  ;;  %v1170_v46 = vadd.f32 %v1169_v4, %v2233_v55  ;;  %v1171_v19 = vpop.f32.mrb[63].mxu1  ;;  %v812_v55 = vadd.f32 %v2171_v9, %v2187_v22  ;;  %v816_v9 = vadd.f32 %v2175_v12, %v2187_v22 }
 0x1fd   : > { %1206 = vst [vmem:[%s2272_s20 + $0x60] sm:$0xff] %v1422_v52  ;;  %1231 = vst [vmem:[%s2272_s20 + $0x128] sm:$0xff] %v1168_v61  ;;  %v1426_v6 = vadd.f32 %v1109_v44, %v804_v51  ;;  %v1111_v20 = vpop.f32.mrb[15].mxu0  ;;  %v1172_v62 = vadd.f32 %v1171_v19, %v2235_v11  ;;  %v820_v12 = vadd.f32 %v2177_v14, %v2185_v21 }
 0x1fe   : > { %1207 = vst [vmem:[%s2272_s20 + $0x68] sm:$0xff] %v1424_v13  ;;  %1232 = vst [vmem:[%s2272_s20 + $0x130] sm:$0xff] %v1170_v46  ;;  %v1428_v49 = vadd.f32 %v1111_v20, %v806_v5 }
 0x1ff   : > { %1208 = vst [vmem:[%s2272_s20 + $0x70] sm:$0xff] %v1426_v6  ;;  %1233 = vst [vmem:[%s2272_s20 + $0x138] sm:$0xff] %v1172_v62 }
 0x200   : > { %1209 = vst [vmem:[%s2272_s20 + $0x78] sm:$0xff] %v1428_v49 }
 0x201   : > { %v1175_v23 = vpop.f32.mrb[64].mxu1 }
 0x202   : > { %v1115_v56 = vpop.f32.mrb[16].mxu0  ;;  %v1176_v50 = vadd.f32 %v1175_v23, %v2239_v27  ;;  %v1177_v11 = vpop.f32.mrb[65].mxu1 }
 0x203   : > { %v1430_v57 = vadd.f32 %v1115_v56, %v810_v7  ;;  %v1117_v53 = vpop.f32.mrb[17].mxu0  ;;  %v1178_v58 = vadd.f32 %v1177_v11, %v2242_v36  ;;  %v1179_v8 = vpop.f32.mrb[66].mxu1 }
 0x204   : > { %1234 = vst [vmem:[%s2272_s20 + $0x140] sm:$0xff] %v1176_v50  ;;  %v1432_v30 = vadd.f32 %v1117_v53, %v812_v55  ;;  %v1119_v27 = vpop.f32.mrb[18].mxu0  ;;  %v1180_v54 = vadd.f32 %v1179_v8, %v2245_v41  ;;  %v1181_v10 = vpop.f32.mrb[67].mxu1  ;;  %v822_v41 = vadd.f32 %v2179_v15, %v2187_v22  ;;  %v826_v15 = vadd.f32 %v2183_v18, %v2187_v22 }
 0x205   : > { %1210 = vst [vmem:[%s2272_s20 + $0x80] sm:$0xff] %v1430_v57  ;;  %1235 = vst [vmem:[%s2272_s20 + $0x148] sm:$0xff] %v1178_v58  ;;  %v1434_v34 = vadd.f32 %v1119_v27, %v814_v63  ;;  %v1121_v59 = vpop.f32.mrb[19].mxu0  ;;  %v1182_v36 = vadd.f32 %v1181_v10, %v2247_v42 }
 0x206   : > { %1211 = vst [vmem:[%s2272_s20 + $0x88] sm:$0xff] %v1432_v30  ;;  %1236 = vst [vmem:[%s2272_s20 + $0x150] sm:$0xff] %v1180_v54  ;;  %v1436_v26 = vadd.f32 %v1121_v59, %v816_v9 }
 0x207   : > { %1212 = vst [vmem:[%s2272_s20 + $0x90] sm:$0xff] %v1434_v34  ;;  %1237 = vst [vmem:[%s2272_s20 + $0x158] sm:$0xff] %v1182_v36 }
 0x208   : > { %1213 = vst [vmem:[%s2272_s20 + $0x98] sm:$0xff] %v1436_v26 }
 0x209   : > { %v1185_v29 = vpop.f32.mrb[68].mxu1 }
 0x20a   : > { %v1125_v0 = vpop.f32.mrb[20].mxu0  ;;  %v1186_v42 = vadd.f32 %v1185_v29, %v2251_v17  ;;  %v1187_v1 = vpop.f32.mrb[69].mxu1 }
 0x20b   : > { %v1438_v24 = vadd.f32 %v1125_v0, %v820_v12  ;;  %v1127_v40 = vpop.f32.mrb[21].mxu0  ;;  %v1188_v14 = vadd.f32 %v1187_v1, %v2254_v25  ;;  %v1189_v37 = vpop.f32.mrb[70].mxu1 }
 0x20c   : > { %1238 = vst [vmem:[%s2272_s20 + $0x160] sm:$0xff] %v1186_v42  ;;  %v1440_v2 = vadd.f32 %v1127_v40, %v822_v41  ;;  %v1129_v17 = vpop.f32.mrb[22].mxu0  ;;  %v1190_v43 = vadd.f32 %v1189_v37, %v2258_v31  ;;  %v1191_v16 = vpop.f32.mrb[71].mxu1 }
 0x20d   : > { %1214 = vst [vmem:[%s2272_s20 + $0xa0] sm:$0xff] %v1438_v24  ;;  %1239 = vst [vmem:[%s2272_s20 + $0x168] sm:$0xff] %v1188_v14  ;;  %v1442_v21 = vadd.f32 %v1129_v17, %v824_v39  ;;  %v1131_v25 = vpop.f32.mrb[23].mxu0  ;;  %v1192_v45 = vadd.f32 %v1191_v16, %v2260_v35 }
 0x20e   : > { %1215 = vst [vmem:[%s2272_s20 + $0xa8] sm:$0xff] %v1440_v2  ;;  %1240 = vst [vmem:[%s2272_s20 + $0x170] sm:$0xff] %v1190_v43  ;;  %v1444_v18 = vadd.f32 %v1131_v25, %v826_v15 }
 0x20f   : > { %1216 = vst [vmem:[%s2272_s20 + $0xb0] sm:$0xff] %v1442_v21  ;;  %1241 = vst [vmem:[%s2272_s20 + $0x178] sm:$0xff] %v1192_v45 }
 0x210   : > { %1217 = vst [vmem:[%s2272_s20 + $0xb8] sm:$0xff] %v1444_v18 }
 0x211   : > { %1718 = shalt.err (!%p1715_p2)
}
 0x212   : > { %s1719_s10 = scalar_lea.hbm %s2384_s27, 6144  ;;  %s1723_s22 = scalar_lea.hbm %s2438_s3, 12288 }
 0x213   : > { %p1720_p13 = scmp.ne.s32.totalorder %s2384_s27, %s1719_s10  ;;  %p1724_p4 = scmp.lt.u32.totalorder %s2384_s27, %s2438_s3 }
 0x214   : > { %p1725_p9 = scmp.lt.u32.totalorder %s1723_s22, %s1719_s10  ;;  %p1727_p11 = scmp.lt.u32.totalorder %s1719_s10, %s2384_s27 }
 0x215   : > { %p1721_p6 = pnand %p1720_p13, %p2452_p0 }
 0x216   : > { %p1726_p8 = por %p1725_p9, %p1724_p4 }
 0x217   : > { %p1722_p10 = pneg %p1721_p6 }
 0x218   : > { %p1728_p1 = por %p1727_p11, %p1726_p8 }
 0x21a   : > { %p1729_p3 = pnand %p1728_p1, %p1722_p10 }
 0x21c   : > { %1732 = shalt.err (!%p1729_p3)
}
 0x21d   : > { %s1785_s18 = smov 256   ;;  %s1786_s20 = smov 16  }
 0x21e   : > { %1555 = dma.vmem_to_hbm [thread:$0]  (%p2452_p0), %s2386_s21, 6144, %s2384_s27, %s1243_s23, %s1785_s18, %s1785_s18, %s1786_s20  }
 0x21f PF: > { %s1272_s17 = sand.u32 1, %s1763_s12   ;;  %p2453_p5 = scmp.ne.s32.totalorder %s2443_s19, 0 }
 0x220   : > { %p2454_p7 = scmp.ge.s32.totalorder %s1775_s15, 2  ;;  %s1273_s16 = scalar_lea.sflag [#allocation4], %s1272_s17 }
 0x222   : > { %p1569_p12 = pnand %p2454_p7, %p2453_p5 }
 0x224   : > { %1758 = dma.done.wait (!%p1569_p12), %s1273_s16, 6144  }
 0x225   : > { %1760 = vsyncadd (!%p1569_p12), %s1273_s16, 4294961152  ;;  %p17_p2 = scmp.ge.s32.totalorder %s1917_s4, 4   ;;  %s2455_s12 = smov %s1767_s13 }
 0x226   : > { %s2456_s13 = smov %s1771_s14  ;;  %s2457_s14 = smov %s1927_s6 }
 0x227   : > { %s2458_s15 = smov %s1917_s4  ;;  %19 = sbr.rel (!%p17_p2) target bundleno = 6 (0x6), region = 85 }
 0x22e   :  { %1278 = vsyncpa [#allocation3], 1 }
 0x22f   :  { %1280 = vsyncpa [#allocation3 + $0x1], 1 }
 0x230   :  { %1281 = vsyncpa [#allocation6], 1 }
 0x231   :  { %1282 = vsyncpa [#allocation4], 1 }
 0x232   :  { %1284 = vsyncpa [#allocation4 + $0x1], 1 }

</bundles_post_ra>
